<compile_context>
chip_gen: v5e
topology: v5e:2x2
jax: 0.10.0
libtpu: 0.0.40
codegen_flags: <defaults>
</compile_context>

<pallas_src>
import math
from functools import partial

import numpy as np
import jax
import jax.numpy as jnp
from jax import lax
from jax.experimental import pallas as pl
from jax.experimental.pallas import tpu as pltpu

MAX_ORDER = 3
HIDDEN = (MAX_ORDER + 1) ** 2          # 16
OMEGA = 10.0
TPDIM = 2
FEAT = TPDIM + 3                       # 5
MAX_SUB = 512                          # sublane-tiles per block -> up to 65536 pts (~11 MB dbl-buffered)
STRIP = 8                              # inner strip: every intermediate is exactly one (8,128) vreg


# ---------------- fast sine: Cody-Waite reduction + degree-9 odd minimax-ish poly ----------------
_INV_TWO_PI = 0.15915494309189535
_TWO_PI_HI = 6.28125                   # exactly representable in f32
_TWO_PI_LO = 0.0019353071795864769     # 2*pi - _TWO_PI_HI


def _fit_sin_poly(degree=9):
    """Odd-polynomial least-squares fit of sin on [-pi, pi] at Chebyshev nodes (max err ~1e-5)."""
    n = 2048
    t = np.cos((np.arange(n) + 0.5) * np.pi / n)
    x = np.pi * t
    powers = np.arange(1, degree + 1, 2)
    a = np.power(x[:, None], powers[None, :])
    c, *_ = np.linalg.lstsq(a, np.sin(x), rcond=None)
    return tuple(float(v) for v in c)


_SIN_C1, _SIN_C3, _SIN_C5, _SIN_C7, _SIN_C9 = _fit_sin_poly(9)


def _fast_sin(x):
    """sin(x) with one range-reduction step + Horner degree-9 odd poly. VALU-only, ~10 ops."""
    k = jnp.floor(x * _INV_TWO_PI + 0.5)
    y = x - k * _TWO_PI_HI
    y = y - k * _TWO_PI_LO
    y2 = y * y
    p = _SIN_C9
    p = p * y2 + _SIN_C7
    p = p * y2 + _SIN_C5
    p = p * y2 + _SIN_C3
    p = p * y2 + _SIN_C1
    return p * y


# ---------------- spherical-harmonics building blocks ----------------
def _legendre_and_trig(ct, st, cphi, sphi, max_order):
    """Associated Legendre P_l^m(cos theta) (Condon-Shortley phase) + cos/sin(m*phi).

    Trig-free recurrences from cos/sin(theta) and cos/sin(phi); unrolled at trace time.
    """
    L = max_order
    P = {(0, 0): jnp.ones_like(ct)}
    for m in range(1, L + 1):
        P[(m, m)] = (-(2.0 * m - 1.0)) * st * P[(m - 1, m - 1)]
    for m in range(0, L):
        P[(m + 1, m)] = (2.0 * m + 1.0) * ct * P[(m, m)]
    for m in range(0, L + 1):
        for l in range(m + 2, L + 1):
            P[(l, m)] = ((2.0 * l - 1.0) * ct * P[(l - 1, m)]
                         - (l + m - 1.0) * P[(l - 2, m)]) / float(l - m)
    cosm = [jnp.ones_like(cphi)]
    sinm = [jnp.zeros_like(sphi)]
    for m in range(1, L + 1):
        cp, sp = cosm[m - 1], sinm[m - 1]
        cosm.append(cp * cphi - sp * sphi)
        sinm.append(sp * cphi + cp * sphi)
    return P, cosm, sinm


def _sh_column(P, cosm, sinm, l, m):
    am = abs(m)
    K = math.sqrt((2 * l + 1) / (4.0 * math.pi)
                  * math.factorial(l - am) / math.factorial(l + am))
    if m == 0:
        return K * P[(l, 0)]
    if m > 0:
        return math.sqrt(2.0) * K * cosm[m] * P[(l, m)]
    return math.sqrt(2.0) * K * sinm[am] * P[(l, am)]


# ---------------- Pallas kernel ----------------
def _shinr_kernel(x_ref, w_ref, b_ref, o_ref, *, max_order, tpdim, sub, strip):
    # x_ref: (feat, sub, 128) VMEM
    # w_ref: (hidden*tpdim,) SMEM, omega folded in     b_ref: (hidden,) SMEM, omega folded in
    # o_ref: (hidden, sub, 128) VMEM
    n_strips = sub // strip

    @pl.loop(0, n_strips)
    def _(s):
        row0 = pl.multiple_of(s * strip, strip)
        rows = pl.ds(row0, strip)

        px = x_ref[tpdim + 0, rows, :]                  # (strip, 128)
        py = x_ref[tpdim + 1, rows, :]
        pz = x_ref[tpdim + 2, rows, :]

        rho2 = px * px + py * py
        r2 = rho2 + pz * pz
        inv_r = lax.rsqrt(r2)                           # EUP
        ct = pz * inv_r                                 # cos(theta)
        safe = rho2 > 1e-24                             # atan2(0,0) == 0 -> cphi=1, sphi=0
        inv_rho = jnp.where(safe, lax.rsqrt(jnp.where(safe, rho2, 1.0)), 0.0)
        st = rho2 * inv_rho * inv_r                     # sin(theta) = rho/r  (>= 0)
        cphi = jnp.where(safe, px * inv_rho, 1.0)
        sphi = py * inv_rho                             # 0 when unsafe

        P, cosm, sinm = _legendre_and_trig(ct, st, cphi, sphi, max_order)
        tp_rows = [x_ref[d, rows, :] for d in range(tpdim)]

        def lin_sin(idx):
            # sin(omega*(W tp + b)) with omega pre-folded into w_ref / b_ref (exact rewrite).
            acc = b_ref[idx]                            # scalar from SMEM
            for d in range(tpdim):
                acc = acc + w_ref[idx * tpdim + d] * tp_rows[d]
            return _fast_sin(acc)

        for l in range(max_order + 1):
            base = l * l + l                            # row of m = 0
            k0 = math.sqrt((2 * l + 1) / (4.0 * math.pi))
            o_ref[base, rows, :] = (k0 * P[(l, 0)]) * lin_sin(base)
            for m in range(1, l + 1):
                km = math.sqrt(2.0) * math.sqrt(
                    (2 * l + 1) / (4.0 * math.pi)
                    * math.factorial(l - m) / math.factorial(l + m))
                t = km * P[(l, m)]                      # shared between the +m and -m rows
                o_ref[base + m, rows, :] = (t * cosm[m]) * lin_sin(base + m)
                o_ref[base - m, rows, :] = (t * sinm[m]) * lin_sin(base - m)


# ---------------- tiling ----------------
def _num_tensorcores():
    """2 TensorCores on v7x, 1 on v5e/v6e (conservative default: 1)."""
    try:
        kind = jax.devices()[0].device_kind.lower()
    except Exception:
        return 1
    return 2 if "v7" in kind else 1


def _pick_sub_tile(n_points, num_cores):
    """Sublane-tiles per block. Single-TC: largest block that fits (grid is a serial loop, don't
    split). Two TCs (v7x): even grid length so the parallel axis shards evenly across cores."""
    chunks = max(1, pl.cdiv(n_points, 128))
    if num_cores <= 1:
        sub = min(MAX_SUB, chunks)
    else:
        steps = max(2, 2 * pl.cdiv(chunks, 2 * MAX_SUB))   # smallest even step count with sub<=MAX_SUB
        sub = pl.cdiv(chunks, steps)
    sub = max(STRIP, pl.cdiv(sub, STRIP) * STRIP)
    return int(min(sub, MAX_SUB))


# ---------------- wrappers ----------------
def spherical_harmonics_layer_lane_major(xT, weight, bias, *, max_order=MAX_ORDER,
                                         omega=OMEGA, tpdim=TPDIM):
    """Lane-major entry point (no transposes): xT (feat, N) -> (hidden, N)."""
    hidden = (max_order + 1) ** 2
    feat, n = xT.shape
    xT = xT.astype(jnp.float32)

    sub = _pick_sub_tile(n, _num_tensorcores())
    block_pts = sub * 128
    n_pad = pl.cdiv(n, block_pts) * block_pts
    n_chunks = n_pad // 128
    if n_pad != n:
        # padding value 1.0 keeps rsqrt finite; padded columns are sliced off afterwards
        xT = jnp.pad(xT, ((0, 0), (0, n_pad - n)), constant_values=1.0)
    x3 = xT.reshape(feat, n_chunks, 128)

    # Fold omega into the Linear (exact: sin(omega*(W t + b)) == sin((omega W) t + omega b)).
    w = (omega * weight.astype(jnp.float32)).reshape(hidden * tpdim)
    b = (omega * bias.astype(jnp.float32)).reshape(hidden)

    kernel = partial(_shinr_kernel, max_order=max_order, tpdim=tpdim, sub=sub, strip=STRIP)
    out3 = pl.pallas_call(
        kernel,
        out_shape=jax.ShapeDtypeStruct((hidden, n_chunks, 128), jnp.float32),
        grid=(n_chunks // sub,),
        in_specs=[
            pl.BlockSpec((feat, sub, 128), lambda i: (0, i, 0)),
            pl.BlockSpec(memory_space=pltpu.MemorySpace.SMEM),   # weight (hidden*tpdim,)
            pl.BlockSpec(memory_space=pltpu.MemorySpace.SMEM),   # bias   (hidden,)
        ],
        out_specs=pl.BlockSpec((hidden, sub, 128), lambda i: (0, i, 0)),
        compiler_params=pltpu.CompilerParams(dimension_semantics=("parallel",)),
    )(x3, w, b)

    return out3.reshape(hidden, n_pad)[:, :n]


@partial(jax.jit, static_argnames=("max_order", "omega", "tpdim"))
def spherical_harmonics_layer(inp, weight, bias, *, max_order=MAX_ORDER,
                              omega=OMEGA, tpdim=TPDIM):
    """PyTorch-contract wrapper: inp [..., tpdim+3]; weight [hidden, tpdim]; bias [hidden]
    -> [..., hidden]. Pays one transpose each way; prefer the lane-major entry point for fusion."""
    hidden = (max_order + 1) ** 2
    feat = tpdim + 3
    lead = inp.shape[:-1]
    n = int(np.prod(lead)) if lead else 1
    flat = inp.reshape(n, feat).astype(jnp.float32)
    outT = spherical_harmonics_layer_lane_major(flat.T, weight, bias, max_order=max_order,
                                                omega=omega, tpdim=tpdim)     # (hidden, n)
    return outT.T.reshape(lead + (hidden,))


# ---------------- pure-JAX reference (identical math, jnp.sin) ----------------
def ref_forward(inp, weight, bias, max_order=MAX_ORDER, omega=OMEGA, tpdim=TPDIM):
    inp = inp.astype(jnp.float32)
    tp = inp[..., :tpdim]
    px = inp[..., tpdim + 0]
    py = inp[..., tpdim + 1]
    pz = inp[..., tpdim + 2]
    r = jnp.sqrt(px * px + py * py + pz * pz)
    rho = jnp.sqrt(px * px + py * py)
    ct, st = pz / r, rho / r
    safe = rho > 1e-12
    rho_s = jnp.where(safe, rho, 1.0)
    cphi = jnp.where(safe, px / rho_s, 1.0)
    sphi = jnp.where(safe, py / rho_s, 0.0)
    P, cosm, sinm = _legendre_and_trig(ct, st, cphi, sphi, max_order)
    cols = [_sh_column(P, cosm, sinm, l, m)
            for l in range(max_order + 1) for m in range(-l, l + 1)]
    sh = jnp.stack(cols, axis=-1)
    w = weight.astype(jnp.float32)
    b = bias.astype(jnp.float32)
    lin = jnp.broadcast_to(b, sh.shape)
    for d in range(tpdim):
        lin = lin + tp[..., d:d + 1] * w[:, d]
    return sh * jnp.sin(omega * lin)


if __name__ == "__main__":
    key = jax.random.PRNGKey(0)
    k1, k2, k3, k4 = jax.random.split(key, 4)

    B, N = 2, 2048                                 # 4096 points
    xyz = jax.random.normal(k1, (B, N, 3), dtype=jnp.float32)
    xyz = xyz / jnp.linalg.norm(xyz, axis=-1, keepdims=True)     # points on the sphere
    tp = jax.random.uniform(k2, (B, N, TPDIM), minval=-1.0, maxval=1.0, dtype=jnp.float32)
    inp = jnp.concatenate([tp, xyz], axis=-1)      # [B, N, tpdim+3]

    # nn.Linear(tpdim, hidden): weight.uniform_(-1, 1); default bias ~ U(-1/sqrt(in), 1/sqrt(in))
    weight = jax.random.uniform(k3, (HIDDEN, TPDIM), minval=-1.0, maxval=1.0, dtype=jnp.float32)
    bound = 1.0 / math.sqrt(TPDIM)
    bias = jax.random.uniform(k4, (HIDDEN,), minval=-bound, maxval=bound, dtype=jnp.float32)

    out = spherical_harmonics_layer(inp, weight, bias)
    jax.block_until_ready(out)

    ref = ref_forward(inp, weight, bias)
    assert out.shape == (B, N, HIDDEN) and out.dtype == jnp.float32
    assert jnp.allclose(out, ref, rtol=1e-4, atol=1e-4), "mismatch vs JAX reference"
    print("KERNEL_OK")
</pallas_src>

<mosaic_0001>
module attributes {stable_mosaic.version = 11 : i64} {
  func.func @_shinr_kernel(%arg0: i32, %arg1: memref<5x32x128xf32, #tpu.memory_space<vmem>>, %arg2: memref<32xf32, #tpu.memory_space<smem>>, %arg3: memref<16xf32, #tpu.memory_space<smem>>, %arg4: memref<16x32x128xf32, #tpu.memory_space<vmem>>) attributes {dimension_semantics = [#tpu.dimension_semantics<parallel>], iteration_bounds = array<i64: 1>, scalar_prefetch = 0 : i64, scratch_operands = 0 : i64, tpu.core_type = #tpu.core_type<tc>, window_params = [{transform_indices = @transform_0, window_bounds = array<i64: 5, 32, 128>}, {transform_indices = @transform_1, window_bounds = array<i64: 32>}, {transform_indices = @transform_2, window_bounds = array<i64: 16>}, {transform_indices = @transform_3, window_bounds = array<i64: 16, 32, 128>}]} {
    %c0_i32 = arith.constant 0 : i32
    %c4_i32 = arith.constant 4 : i32
    %0 = arith.addi %c0_i32, %c4_i32 : i32
    %c1_i32 = arith.constant 1 : i32
    scf.for %arg5 = %c0_i32 to %0 step %c1_i32  : i32 {
      %c1_i32_1 = arith.constant 1 : i32
      %1 = arith.muli %arg5, %c1_i32_1 : i32
      %c0_i32_2 = arith.constant 0 : i32
      %2 = arith.addi %c0_i32_2, %1 : i32
      %c8_i32 = arith.constant 8 : i32
      %3 = arith.muli %2, %c8_i32 : i32
      %4 = tpu.assume_multiple %3, 8 : i32
      %c2 = arith.constant 2 : index
      %5 = arith.index_cast %4 : i32 to index
      %c0 = arith.constant 0 : index
      %6 = vector.load %arg1[%c2, %5, %c0] : memref<5x32x128xf32, #tpu.memory_space<vmem>>, vector<1x8x128xf32>
      %7 = vector.shape_cast %6 : vector<1x8x128xf32> to vector<8x128xf32>
      %c3 = arith.constant 3 : index
      %8 = arith.index_cast %4 : i32 to index
      %c0_3 = arith.constant 0 : index
      %9 = vector.load %arg1[%c3, %8, %c0_3] : memref<5x32x128xf32, #tpu.memory_space<vmem>>, vector<1x8x128xf32>
      %10 = vector.shape_cast %9 : vector<1x8x128xf32> to vector<8x128xf32>
      %c4 = arith.constant 4 : index
      %11 = arith.index_cast %4 : i32 to index
      %c0_4 = arith.constant 0 : index
      %12 = vector.load %arg1[%c4, %11, %c0_4] : memref<5x32x128xf32, #tpu.memory_space<vmem>>, vector<1x8x128xf32>
      %13 = vector.shape_cast %12 : vector<1x8x128xf32> to vector<8x128xf32>
      %14 = arith.mulf %7, %7 : vector<8x128xf32>
      %15 = arith.mulf %10, %10 : vector<8x128xf32>
      %16 = arith.addf %14, %15 : vector<8x128xf32>
      %17 = arith.mulf %13, %13 : vector<8x128xf32>
      %18 = arith.addf %16, %17 : vector<8x128xf32>
      %19 = math.rsqrt %18 : vector<8x128xf32>
      %20 = arith.mulf %13, %19 : vector<8x128xf32>
      %cst = arith.constant 1.000000e-24 : f32
      %21 = vector.broadcast %cst : f32 to vector<8x128xf32>
      %22 = arith.cmpf ogt, %16, %21 : vector<8x128xf32>
      %cst_5 = arith.constant 1.000000e+00 : f32
      %23 = vector.broadcast %cst_5 : f32 to vector<8x128xf32>
      %24 = arith.select %22, %16, %23 : vector<8x128xi1>, vector<8x128xf32>
      %25 = math.rsqrt %24 : vector<8x128xf32>
      %cst_6 = arith.constant 0.000000e+00 : f32
      %26 = vector.broadcast %cst_6 : f32 to vector<8x128xf32>
      %27 = arith.select %22, %25, %26 : vector<8x128xi1>, vector<8x128xf32>
      %28 = arith.mulf %16, %27 : vector<8x128xf32>
      %29 = arith.mulf %28, %19 : vector<8x128xf32>
      %30 = arith.mulf %7, %27 : vector<8x128xf32>
      %cst_7 = arith.constant 1.000000e+00 : f32
      %31 = vector.broadcast %cst_7 : f32 to vector<8x128xf32>
      %32 = arith.select %22, %30, %31 : vector<8x128xi1>, vector<8x128xf32>
      %33 = arith.mulf %10, %27 : vector<8x128xf32>
      %cst_8 = arith.constant 1.000000e+00 : f32
      %34 = vector.broadcast %cst_8 : f32 to vector<8x128xf32>
      %cst_9 = arith.constant -1.000000e+00 : f32
      %35 = vector.broadcast %cst_9 : f32 to vector<8x128xf32>
      %36 = arith.mulf %35, %29 : vector<8x128xf32>
      %37 = arith.mulf %36, %34 : vector<8x128xf32>
      %cst_10 = arith.constant -3.000000e+00 : f32
      %38 = vector.broadcast %cst_10 : f32 to vector<8x128xf32>
      %39 = arith.mulf %38, %29 : vector<8x128xf32>
      %40 = arith.mulf %39, %37 : vector<8x128xf32>
      %cst_11 = arith.constant -5.000000e+00 : f32
      %41 = vector.broadcast %cst_11 : f32 to vector<8x128xf32>
      %42 = arith.mulf %41, %29 : vector<8x128xf32>
      %43 = arith.mulf %42, %40 : vector<8x128xf32>
      %cst_12 = arith.constant 1.000000e+00 : f32
      %44 = vector.broadcast %cst_12 : f32 to vector<8x128xf32>
      %45 = arith.mulf %44, %20 : vector<8x128xf32>
      %46 = arith.mulf %45, %34 : vector<8x128xf32>
      %cst_13 = arith.constant 3.000000e+00 : f32
      %47 = vector.broadcast %cst_13 : f32 to vector<8x128xf32>
      %48 = arith.mulf %47, %20 : vector<8x128xf32>
      %49 = arith.mulf %48, %37 : vector<8x128xf32>
      %cst_14 = arith.constant 5.000000e+00 : f32
      %50 = vector.broadcast %cst_14 : f32 to vector<8x128xf32>
      %51 = arith.mulf %50, %20 : vector<8x128xf32>
      %52 = arith.mulf %51, %40 : vector<8x128xf32>
      %cst_15 = arith.constant 3.000000e+00 : f32
      %53 = vector.broadcast %cst_15 : f32 to vector<8x128xf32>
      %54 = arith.mulf %53, %20 : vector<8x128xf32>
      %55 = arith.mulf %54, %46 : vector<8x128xf32>
      %cst_16 = arith.constant 1.000000e+00 : f32
      %56 = vector.broadcast %cst_16 : f32 to vector<8x128xf32>
      %57 = arith.mulf %56, %34 : vector<8x128xf32>
      %58 = arith.subf %55, %57 : vector<8x128xf32>
      %cst_17 = arith.constant 2.000000e+00 : f32
      %59 = vector.broadcast %cst_17 : f32 to vector<8x128xf32>
      %60 = arith.divf %58, %59 : vector<8x128xf32>
      %cst_18 = arith.constant 5.000000e+00 : f32
      %61 = vector.broadcast %cst_18 : f32 to vector<8x128xf32>
      %62 = arith.mulf %61, %20 : vector<8x128xf32>
      %63 = arith.mulf %62, %60 : vector<8x128xf32>
      %cst_19 = arith.constant 2.000000e+00 : f32
      %64 = vector.broadcast %cst_19 : f32 to vector<8x128xf32>
      %65 = arith.mulf %64, %46 : vector<8x128xf32>
      %66 = arith.subf %63, %65 : vector<8x128xf32>
      %cst_20 = arith.constant 3.000000e+00 : f32
      %67 = vector.broadcast %cst_20 : f32 to vector<8x128xf32>
      %68 = arith.divf %66, %67 : vector<8x128xf32>
      %cst_21 = arith.constant 5.000000e+00 : f32
      %69 = vector.broadcast %cst_21 : f32 to vector<8x128xf32>
      %70 = arith.mulf %69, %20 : vector<8x128xf32>
      %71 = arith.mulf %70, %49 : vector<8x128xf32>
      %cst_22 = arith.constant 3.000000e+00 : f32
      %72 = vector.broadcast %cst_22 : f32 to vector<8x128xf32>
      %73 = arith.mulf %72, %37 : vector<8x128xf32>
      %74 = arith.subf %71, %73 : vector<8x128xf32>
      %cst_23 = arith.constant 2.000000e+00 : f32
      %75 = vector.broadcast %cst_23 : f32 to vector<8x128xf32>
      %76 = arith.divf %74, %75 : vector<8x128xf32>
      %cst_24 = arith.constant 1.000000e+00 : f32
      %77 = vector.broadcast %cst_24 : f32 to vector<8x128xf32>
      %cst_25 = arith.constant 0.000000e+00 : f32
      %78 = vector.broadcast %cst_25 : f32 to vector<8x128xf32>
      %79 = arith.mulf %77, %32 : vector<8x128xf32>
      %80 = arith.mulf %78, %33 : vector<8x128xf32>
      %81 = arith.subf %79, %80 : vector<8x128xf32>
      %82 = arith.mulf %78, %32 : vector<8x128xf32>
      %83 = arith.mulf %77, %33 : vector<8x128xf32>
      %84 = arith.addf %82, %83 : vector<8x128xf32>
      %85 = arith.mulf %81, %32 : vector<8x128xf32>
      %86 = arith.mulf %84, %33 : vector<8x128xf32>
      %87 = arith.subf %85, %86 : vector<8x128xf32>
      %88 = arith.mulf %84, %32 : vector<8x128xf32>
      %89 = arith.mulf %81, %33 : vector<8x128xf32>
      %90 = arith.addf %88, %89 : vector<8x128xf32>
      %91 = arith.mulf %87, %32 : vector<8x128xf32>
      %92 = arith.mulf %90, %33 : vector<8x128xf32>
      %93 = arith.subf %91, %92 : vector<8x128xf32>
      %94 = arith.mulf %90, %32 : vector<8x128xf32>
      %95 = arith.mulf %87, %33 : vector<8x128xf32>
      %96 = arith.addf %94, %95 : vector<8x128xf32>
      %c0_26 = arith.constant 0 : index
      %97 = arith.index_cast %4 : i32 to index
      %c0_27 = arith.constant 0 : index
      %98 = vector.load %arg1[%c0_26, %97, %c0_27] : memref<5x32x128xf32, #tpu.memory_space<vmem>>, vector<1x8x128xf32>
      %99 = vector.shape_cast %98 : vector<1x8x128xf32> to vector<8x128xf32>
      %c1 = arith.constant 1 : index
      %100 = arith.index_cast %4 : i32 to index
      %c0_28 = arith.constant 0 : index
      %101 = vector.load %arg1[%c1, %100, %c0_28] : memref<5x32x128xf32, #tpu.memory_space<vmem>>, vector<1x8x128xf32>
      %102 = vector.shape_cast %101 : vector<1x8x128xf32> to vector<8x128xf32>
      %cst_29 = arith.constant 0.282094806 : f32
      %103 = vector.broadcast %cst_29 : f32 to vector<8x128xf32>
      %104 = arith.mulf %103, %34 : vector<8x128xf32>
      %c0_30 = arith.constant 0 : index
      %105 = memref.load %arg3[%c0_30] : memref<16xf32, #tpu.memory_space<smem>>
      %c0_31 = arith.constant 0 : index
      %106 = memref.load %arg2[%c0_31] : memref<32xf32, #tpu.memory_space<smem>>
      %107 = vector.broadcast %106 : f32 to vector<8x128xf32>
      %108 = arith.mulf %107, %99 : vector<8x128xf32>
      %109 = vector.broadcast %105 : f32 to vector<8x128xf32>
      %110 = arith.addf %109, %108 : vector<8x128xf32>
      %c1_32 = arith.constant 1 : index
      %111 = memref.load %arg2[%c1_32] : memref<32xf32, #tpu.memory_space<smem>>
      %112 = vector.broadcast %111 : f32 to vector<8x128xf32>
      %113 = arith.mulf %112, %102 : vector<8x128xf32>
      %114 = arith.addf %110, %113 : vector<8x128xf32>
      %cst_33 = arith.constant 0.159154937 : f32
      %115 = vector.broadcast %cst_33 : f32 to vector<8x128xf32>
      %116 = arith.mulf %114, %115 : vector<8x128xf32>
      %cst_34 = arith.constant 5.000000e-01 : f32
      %117 = vector.broadcast %cst_34 : f32 to vector<8x128xf32>
      %118 = arith.addf %116, %117 : vector<8x128xf32>
      %119 = math.floor %118 : vector<8x128xf32>
      %cst_35 = arith.constant 6.281250e+00 : f32
      %120 = vector.broadcast %cst_35 : f32 to vector<8x128xf32>
      %121 = arith.mulf %119, %120 : vector<8x128xf32>
      %122 = arith.subf %114, %121 : vector<8x128xf32>
      %cst_36 = arith.constant 0.00193530717 : f32
      %123 = vector.broadcast %cst_36 : f32 to vector<8x128xf32>
      %124 = arith.mulf %119, %123 : vector<8x128xf32>
      %125 = arith.subf %122, %124 : vector<8x128xf32>
      %126 = arith.mulf %125, %125 : vector<8x128xf32>
      %cst_37 = arith.constant 2.1470546E-6 : f32
      %127 = vector.broadcast %cst_37 : f32 to vector<8x128xf32>
      %128 = arith.mulf %127, %126 : vector<8x128xf32>
      %cst_38 = arith.constant -1.92631793E-4 : f32
      %129 = vector.broadcast %cst_38 : f32 to vector<8x128xf32>
      %130 = arith.addf %128, %129 : vector<8x128xf32>
      %131 = arith.mulf %130, %126 : vector<8x128xf32>
      %cst_39 = arith.constant 8.308850e-03 : f32
      %132 = vector.broadcast %cst_39 : f32 to vector<8x128xf32>
      %133 = arith.addf %131, %132 : vector<8x128xf32>
      %134 = arith.mulf %133, %126 : vector<8x128xf32>
      %cst_40 = arith.constant -0.16662401 : f32
      %135 = vector.broadcast %cst_40 : f32 to vector<8x128xf32>
      %136 = arith.addf %134, %135 : vector<8x128xf32>
      %137 = arith.mulf %136, %126 : vector<8x128xf32>
      %cst_41 = arith.constant 0.999979138 : f32
      %138 = vector.broadcast %cst_41 : f32 to vector<8x128xf32>
      %139 = arith.addf %137, %138 : vector<8x128xf32>
      %140 = arith.mulf %139, %125 : vector<8x128xf32>
      %141 = arith.mulf %104, %140 : vector<8x128xf32>
      %c0_42 = arith.constant 0 : index
      %142 = arith.index_cast %4 : i32 to index
      %c0_43 = arith.constant 0 : index
      %143 = vector.load %arg4[%c0_42, %142, %c0_43] : memref<16x32x128xf32, #tpu.memory_space<vmem>>, vector<1x8x128xf32>
      %144 = vector.shape_cast %143 : vector<1x8x128xf32> to vector<8x128xf32>
      %145 = vector.shape_cast %141 : vector<8x128xf32> to vector<1x8x128xf32>
      tpu.vector_store %arg4[%c0_42, %142, %c0_43], %145 {strides = array<i32>} : memref<16x32x128xf32, #tpu.memory_space<vmem>>, vector<1x8x128xf32>,
      %cst_44 = arith.constant 0.488602519 : f32
      %146 = vector.broadcast %cst_44 : f32 to vector<8x128xf32>
      %147 = arith.mulf %146, %46 : vector<8x128xf32>
      %c2_45 = arith.constant 2 : index
      %148 = memref.load %arg3[%c2_45] : memref<16xf32, #tpu.memory_space<smem>>
      %c4_46 = arith.constant 4 : index
      %149 = memref.load %arg2[%c4_46] : memref<32xf32, #tpu.memory_space<smem>>
      %150 = vector.broadcast %149 : f32 to vector<8x128xf32>
      %151 = arith.mulf %150, %99 : vector<8x128xf32>
      %152 = vector.broadcast %148 : f32 to vector<8x128xf32>
      %153 = arith.addf %152, %151 : vector<8x128xf32>
      %c5 = arith.constant 5 : index
      %154 = memref.load %arg2[%c5] : memref<32xf32, #tpu.memory_space<smem>>
      %155 = vector.broadcast %154 : f32 to vector<8x128xf32>
      %156 = arith.mulf %155, %102 : vector<8x128xf32>
      %157 = arith.addf %153, %156 : vector<8x128xf32>
      %cst_47 = arith.constant 0.159154937 : f32
      %158 = vector.broadcast %cst_47 : f32 to vector<8x128xf32>
      %159 = arith.mulf %157, %158 : vector<8x128xf32>
      %cst_48 = arith.constant 5.000000e-01 : f32
      %160 = vector.broadcast %cst_48 : f32 to vector<8x128xf32>
      %161 = arith.addf %159, %160 : vector<8x128xf32>
      %162 = math.floor %161 : vector<8x128xf32>
      %cst_49 = arith.constant 6.281250e+00 : f32
      %163 = vector.broadcast %cst_49 : f32 to vector<8x128xf32>
      %164 = arith.mulf %162, %163 : vector<8x128xf32>
      %165 = arith.subf %157, %164 : vector<8x128xf32>
      %cst_50 = arith.constant 0.00193530717 : f32
      %166 = vector.broadcast %cst_50 : f32 to vector<8x128xf32>
      %167 = arith.mulf %162, %166 : vector<8x128xf32>
      %168 = arith.subf %165, %167 : vector<8x128xf32>
      %169 = arith.mulf %168, %168 : vector<8x128xf32>
      %cst_51 = arith.constant 2.1470546E-6 : f32
      %170 = vector.broadcast %cst_51 : f32 to vector<8x128xf32>
      %171 = arith.mulf %170, %169 : vector<8x128xf32>
      %cst_52 = arith.constant -1.92631793E-4 : f32
      %172 = vector.broadcast %cst_52 : f32 to vector<8x128xf32>
      %173 = arith.addf %171, %172 : vector<8x128xf32>
      %174 = arith.mulf %173, %169 : vector<8x128xf32>
      %cst_53 = arith.constant 8.308850e-03 : f32
      %175 = vector.broadcast %cst_53 : f32 to vector<8x128xf32>
      %176 = arith.addf %174, %175 : vector<8x128xf32>
      %177 = arith.mulf %176, %169 : vector<8x128xf32>
      %cst_54 = arith.constant -0.16662401 : f32
      %178 = vector.broadcast %cst_54 : f32 to vector<8x128xf32>
      %179 = arith.addf %177, %178 : vector<8x128xf32>
      %180 = arith.mulf %179, %169 : vector<8x128xf32>
      %cst_55 = arith.constant 0.999979138 : f32
      %181 = vector.broadcast %cst_55 : f32 to vector<8x128xf32>
      %182 = arith.addf %180, %181 : vector<8x128xf32>
      %183 = arith.mulf %182, %168 : vector<8x128xf32>
      %184 = arith.mulf %147, %183 : vector<8x128xf32>
      %c2_56 = arith.constant 2 : index
      %185 = arith.index_cast %4 : i32 to index
      %c0_57 = arith.constant 0 : index
      %186 = vector.load %arg4[%c2_56, %185, %c0_57] : memref<16x32x128xf32, #tpu.memory_space<vmem>>, vector<1x8x128xf32>
      %187 = vector.shape_cast %186 : vector<1x8x128xf32> to vector<8x128xf32>
      %188 = vector.shape_cast %184 : vector<8x128xf32> to vector<1x8x128xf32>
      tpu.vector_store %arg4[%c2_56, %185, %c0_57], %188 {strides = array<i32>} : memref<16x32x128xf32, #tpu.memory_space<vmem>>, vector<1x8x128xf32>,
      %cst_58 = arith.constant 0.488602519 : f32
      %189 = vector.broadcast %cst_58 : f32 to vector<8x128xf32>
      %190 = arith.mulf %189, %37 : vector<8x128xf32>
      %191 = arith.mulf %190, %81 : vector<8x128xf32>
      %c3_59 = arith.constant 3 : index
      %192 = memref.load %arg3[%c3_59] : memref<16xf32, #tpu.memory_space<smem>>
      %c6 = arith.constant 6 : index
      %193 = memref.load %arg2[%c6] : memref<32xf32, #tpu.memory_space<smem>>
      %194 = vector.broadcast %193 : f32 to vector<8x128xf32>
      %195 = arith.mulf %194, %99 : vector<8x128xf32>
      %196 = vector.broadcast %192 : f32 to vector<8x128xf32>
      %197 = arith.addf %196, %195 : vector<8x128xf32>
      %c7 = arith.constant 7 : index
      %198 = memref.load %arg2[%c7] : memref<32xf32, #tpu.memory_space<smem>>
      %199 = vector.broadcast %198 : f32 to vector<8x128xf32>
      %200 = arith.mulf %199, %102 : vector<8x128xf32>
      %201 = arith.addf %197, %200 : vector<8x128xf32>
      %cst_60 = arith.constant 0.159154937 : f32
      %202 = vector.broadcast %cst_60 : f32 to vector<8x128xf32>
      %203 = arith.mulf %201, %202 : vector<8x128xf32>
      %cst_61 = arith.constant 5.000000e-01 : f32
      %204 = vector.broadcast %cst_61 : f32 to vector<8x128xf32>
      %205 = arith.addf %203, %204 : vector<8x128xf32>
      %206 = math.floor %205 : vector<8x128xf32>
      %cst_62 = arith.constant 6.281250e+00 : f32
      %207 = vector.broadcast %cst_62 : f32 to vector<8x128xf32>
      %208 = arith.mulf %206, %207 : vector<8x128xf32>
      %209 = arith.subf %201, %208 : vector<8x128xf32>
      %cst_63 = arith.constant 0.00193530717 : f32
      %210 = vector.broadcast %cst_63 : f32 to vector<8x128xf32>
      %211 = arith.mulf %206, %210 : vector<8x128xf32>
      %212 = arith.subf %209, %211 : vector<8x128xf32>
      %213 = arith.mulf %212, %212 : vector<8x128xf32>
      %cst_64 = arith.constant 2.1470546E-6 : f32
      %214 = vector.broadcast %cst_64 : f32 to vector<8x128xf32>
      %215 = arith.mulf %214, %213 : vector<8x128xf32>
      %cst_65 = arith.constant -1.92631793E-4 : f32
      %216 = vector.broadcast %cst_65 : f32 to vector<8x128xf32>
      %217 = arith.addf %215, %216 : vector<8x128xf32>
      %218 = arith.mulf %217, %213 : vector<8x128xf32>
      %cst_66 = arith.constant 8.308850e-03 : f32
      %219 = vector.broadcast %cst_66 : f32 to vector<8x128xf32>
      %220 = arith.addf %218, %219 : vector<8x128xf32>
      %221 = arith.mulf %220, %213 : vector<8x128xf32>
      %cst_67 = arith.constant -0.16662401 : f32
      %222 = vector.broadcast %cst_67 : f32 to vector<8x128xf32>
      %223 = arith.addf %221, %222 : vector<8x128xf32>
      %224 = arith.mulf %223, %213 : vector<8x128xf32>
      %cst_68 = arith.constant 0.999979138 : f32
      %225 = vector.broadcast %cst_68 : f32 to vector<8x128xf32>
      %226 = arith.addf %224, %225 : vector<8x128xf32>
      %227 = arith.mulf %226, %212 : vector<8x128xf32>
      %228 = arith.mulf %191, %227 : vector<8x128xf32>
      %c3_69 = arith.constant 3 : index
      %229 = arith.index_cast %4 : i32 to index
      %c0_70 = arith.constant 0 : index
      %230 = vector.load %arg4[%c3_69, %229, %c0_70] : memref<16x32x128xf32, #tpu.memory_space<vmem>>, vector<1x8x128xf32>
      %231 = vector.shape_cast %230 : vector<1x8x128xf32> to vector<8x128xf32>
      %232 = vector.shape_cast %228 : vector<8x128xf32> to vector<1x8x128xf32>
      tpu.vector_store %arg4[%c3_69, %229, %c0_70], %232 {strides = array<i32>} : memref<16x32x128xf32, #tpu.memory_space<vmem>>, vector<1x8x128xf32>,
      %233 = arith.mulf %190, %84 : vector<8x128xf32>
      %c1_71 = arith.constant 1 : index
      %234 = memref.load %arg3[%c1_71] : memref<16xf32, #tpu.memory_space<smem>>
      %c2_72 = arith.constant 2 : index
      %235 = memref.load %arg2[%c2_72] : memref<32xf32, #tpu.memory_space<smem>>
      %236 = vector.broadcast %235 : f32 to vector<8x128xf32>
      %237 = arith.mulf %236, %99 : vector<8x128xf32>
      %238 = vector.broadcast %234 : f32 to vector<8x128xf32>
      %239 = arith.addf %238, %237 : vector<8x128xf32>
      %c3_73 = arith.constant 3 : index
      %240 = memref.load %arg2[%c3_73] : memref<32xf32, #tpu.memory_space<smem>>
      %241 = vector.broadcast %240 : f32 to vector<8x128xf32>
      %242 = arith.mulf %241, %102 : vector<8x128xf32>
      %243 = arith.addf %239, %242 : vector<8x128xf32>
      %cst_74 = arith.constant 0.159154937 : f32
      %244 = vector.broadcast %cst_74 : f32 to vector<8x128xf32>
      %245 = arith.mulf %243, %244 : vector<8x128xf32>
      %cst_75 = arith.constant 5.000000e-01 : f32
      %246 = vector.broadcast %cst_75 : f32 to vector<8x128xf32>
      %247 = arith.addf %245, %246 : vector<8x128xf32>
      %248 = math.floor %247 : vector<8x128xf32>
      %cst_76 = arith.constant 6.281250e+00 : f32
      %249 = vector.broadcast %cst_76 : f32 to vector<8x128xf32>
      %250 = arith.mulf %248, %249 : vector<8x128xf32>
      %251 = arith.subf %243, %250 : vector<8x128xf32>
      %cst_77 = arith.constant 0.00193530717 : f32
      %252 = vector.broadcast %cst_77 : f32 to vector<8x128xf32>
      %253 = arith.mulf %248, %252 : vector<8x128xf32>
      %254 = arith.subf %251, %253 : vector<8x128xf32>
      %255 = arith.mulf %254, %254 : vector<8x128xf32>
      %cst_78 = arith.constant 2.1470546E-6 : f32
      %256 = vector.broadcast %cst_78 : f32 to vector<8x128xf32>
      %257 = arith.mulf %256, %255 : vector<8x128xf32>
      %cst_79 = arith.constant -1.92631793E-4 : f32
      %258 = vector.broadcast %cst_79 : f32 to vector<8x128xf32>
      %259 = arith.addf %257, %258 : vector<8x128xf32>
      %260 = arith.mulf %259, %255 : vector<8x128xf32>
      %cst_80 = arith.constant 8.308850e-03 : f32
      %261 = vector.broadcast %cst_80 : f32 to vector<8x128xf32>
      %262 = arith.addf %260, %261 : vector<8x128xf32>
      %263 = arith.mulf %262, %255 : vector<8x128xf32>
      %cst_81 = arith.constant -0.16662401 : f32
      %264 = vector.broadcast %cst_81 : f32 to vector<8x128xf32>
      %265 = arith.addf %263, %264 : vector<8x128xf32>
      %266 = arith.mulf %265, %255 : vector<8x128xf32>
      %cst_82 = arith.constant 0.999979138 : f32
      %267 = vector.broadcast %cst_82 : f32 to vector<8x128xf32>
      %268 = arith.addf %266, %267 : vector<8x128xf32>
      %269 = arith.mulf %268, %254 : vector<8x128xf32>
      %270 = arith.mulf %233, %269 : vector<8x128xf32>
      %c1_83 = arith.constant 1 : index
      %271 = arith.index_cast %4 : i32 to index
      %c0_84 = arith.constant 0 : index
      %272 = vector.load %arg4[%c1_83, %271, %c0_84] : memref<16x32x128xf32, #tpu.memory_space<vmem>>, vector<1x8x128xf32>
      %273 = vector.shape_cast %272 : vector<1x8x128xf32> to vector<8x128xf32>
      %274 = vector.shape_cast %270 : vector<8x128xf32> to vector<1x8x128xf32>
      tpu.vector_store %arg4[%c1_83, %271, %c0_84], %274 {strides = array<i32>} : memref<16x32x128xf32, #tpu.memory_space<vmem>>, vector<1x8x128xf32>,
      %cst_85 = arith.constant 0.63078314 : f32
      %275 = vector.broadcast %cst_85 : f32 to vector<8x128xf32>
      %276 = arith.mulf %275, %60 : vector<8x128xf32>
      %c6_86 = arith.constant 6 : index
      %277 = memref.load %arg3[%c6_86] : memref<16xf32, #tpu.memory_space<smem>>
      %c12 = arith.constant 12 : index
      %278 = memref.load %arg2[%c12] : memref<32xf32, #tpu.memory_space<smem>>
      %279 = vector.broadcast %278 : f32 to vector<8x128xf32>
      %280 = arith.mulf %279, %99 : vector<8x128xf32>
      %281 = vector.broadcast %277 : f32 to vector<8x128xf32>
      %282 = arith.addf %281, %280 : vector<8x128xf32>
      %c13 = arith.constant 13 : index
      %283 = memref.load %arg2[%c13] : memref<32xf32, #tpu.memory_space<smem>>
      %284 = vector.broadcast %283 : f32 to vector<8x128xf32>
      %285 = arith.mulf %284, %102 : vector<8x128xf32>
      %286 = arith.addf %282, %285 : vector<8x128xf32>
      %cst_87 = arith.constant 0.159154937 : f32
      %287 = vector.broadcast %cst_87 : f32 to vector<8x128xf32>
      %288 = arith.mulf %286, %287 : vector<8x128xf32>
      %cst_88 = arith.constant 5.000000e-01 : f32
      %289 = vector.broadcast %cst_88 : f32 to vector<8x128xf32>
      %290 = arith.addf %288, %289 : vector<8x128xf32>
      %291 = math.floor %290 : vector<8x128xf32>
      %cst_89 = arith.constant 6.281250e+00 : f32
      %292 = vector.broadcast %cst_89 : f32 to vector<8x128xf32>
      %293 = arith.mulf %291, %292 : vector<8x128xf32>
      %294 = arith.subf %286, %293 : vector<8x128xf32>
      %cst_90 = arith.constant 0.00193530717 : f32
      %295 = vector.broadcast %cst_90 : f32 to vector<8x128xf32>
      %296 = arith.mulf %291, %295 : vector<8x128xf32>
      %297 = arith.subf %294, %296 : vector<8x128xf32>
      %298 = arith.mulf %297, %297 : vector<8x128xf32>
      %cst_91 = arith.constant 2.1470546E-6 : f32
      %299 = vector.broadcast %cst_91 : f32 to vector<8x128xf32>
      %300 = arith.mulf %299, %298 : vector<8x128xf32>
      %cst_92 = arith.constant -1.92631793E-4 : f32
      %301 = vector.broadcast %cst_92 : f32 to vector<8x128xf32>
      %302 = arith.addf %300, %301 : vector<8x128xf32>
      %303 = arith.mulf %302, %298 : vector<8x128xf32>
      %cst_93 = arith.constant 8.308850e-03 : f32
      %304 = vector.broadcast %cst_93 : f32 to vector<8x128xf32>
      %305 = arith.addf %303, %304 : vector<8x128xf32>
      %306 = arith.mulf %305, %298 : vector<8x128xf32>
      %cst_94 = arith.constant -0.16662401 : f32
      %307 = vector.broadcast %cst_94 : f32 to vector<8x128xf32>
      %308 = arith.addf %306, %307 : vector<8x128xf32>
      %309 = arith.mulf %308, %298 : vector<8x128xf32>
      %cst_95 = arith.constant 0.999979138 : f32
      %310 = vector.broadcast %cst_95 : f32 to vector<8x128xf32>
      %311 = arith.addf %309, %310 : vector<8x128xf32>
      %312 = arith.mulf %311, %297 : vector<8x128xf32>
      %313 = arith.mulf %276, %312 : vector<8x128xf32>
      %c6_96 = arith.constant 6 : index
      %314 = arith.index_cast %4 : i32 to index
      %c0_97 = arith.constant 0 : index
      %315 = vector.load %arg4[%c6_96, %314, %c0_97] : memref<16x32x128xf32, #tpu.memory_space<vmem>>, vector<1x8x128xf32>
      %316 = vector.shape_cast %315 : vector<1x8x128xf32> to vector<8x128xf32>
      %317 = vector.shape_cast %313 : vector<8x128xf32> to vector<1x8x128xf32>
      tpu.vector_store %arg4[%c6_96, %314, %c0_97], %317 {strides = array<i32>} : memref<16x32x128xf32, #tpu.memory_space<vmem>>, vector<1x8x128xf32>,
      %cst_98 = arith.constant 0.3641828 : f32
      %318 = vector.broadcast %cst_98 : f32 to vector<8x128xf32>
      %319 = arith.mulf %318, %49 : vector<8x128xf32>
      %320 = arith.mulf %319, %81 : vector<8x128xf32>
      %c7_99 = arith.constant 7 : index
      %321 = memref.load %arg3[%c7_99] : memref<16xf32, #tpu.memory_space<smem>>
      %c14 = arith.constant 14 : index
      %322 = memref.load %arg2[%c14] : memref<32xf32, #tpu.memory_space<smem>>
      %323 = vector.broadcast %322 : f32 to vector<8x128xf32>
      %324 = arith.mulf %323, %99 : vector<8x128xf32>
      %325 = vector.broadcast %321 : f32 to vector<8x128xf32>
      %326 = arith.addf %325, %324 : vector<8x128xf32>
      %c15 = arith.constant 15 : index
      %327 = memref.load %arg2[%c15] : memref<32xf32, #tpu.memory_space<smem>>
      %328 = vector.broadcast %327 : f32 to vector<8x128xf32>
      %329 = arith.mulf %328, %102 : vector<8x128xf32>
      %330 = arith.addf %326, %329 : vector<8x128xf32>
      %cst_100 = arith.constant 0.159154937 : f32
      %331 = vector.broadcast %cst_100 : f32 to vector<8x128xf32>
      %332 = arith.mulf %330, %331 : vector<8x128xf32>
      %cst_101 = arith.constant 5.000000e-01 : f32
      %333 = vector.broadcast %cst_101 : f32 to vector<8x128xf32>
      %334 = arith.addf %332, %333 : vector<8x128xf32>
      %335 = math.floor %334 : vector<8x128xf32>
      %cst_102 = arith.constant 6.281250e+00 : f32
      %336 = vector.broadcast %cst_102 : f32 to vector<8x128xf32>
      %337 = arith.mulf %335, %336 : vector<8x128xf32>
      %338 = arith.subf %330, %337 : vector<8x128xf32>
      %cst_103 = arith.constant 0.00193530717 : f32
      %339 = vector.broadcast %cst_103 : f32 to vector<8x128xf32>
      %340 = arith.mulf %335, %339 : vector<8x128xf32>
      %341 = arith.subf %338, %340 : vector<8x128xf32>
      %342 = arith.mulf %341, %341 : vector<8x128xf32>
      %cst_104 = arith.constant 2.1470546E-6 : f32
      %343 = vector.broadcast %cst_104 : f32 to vector<8x128xf32>
      %344 = arith.mulf %343, %342 : vector<8x128xf32>
      %cst_105 = arith.constant -1.92631793E-4 : f32
      %345 = vector.broadcast %cst_105 : f32 to vector<8x128xf32>
      %346 = arith.addf %344, %345 : vector<8x128xf32>
      %347 = arith.mulf %346, %342 : vector<8x128xf32>
      %cst_106 = arith.constant 8.308850e-03 : f32
      %348 = vector.broadcast %cst_106 : f32 to vector<8x128xf32>
      %349 = arith.addf %347, %348 : vector<8x128xf32>
      %350 = arith.mulf %349, %342 : vector<8x128xf32>
      %cst_107 = arith.constant -0.16662401 : f32
      %351 = vector.broadcast %cst_107 : f32 to vector<8x128xf32>
      %352 = arith.addf %350, %351 : vector<8x128xf32>
      %353 = arith.mulf %352, %342 : vector<8x128xf32>
      %cst_108 = arith.constant 0.999979138 : f32
      %354 = vector.broadcast %cst_108 : f32 to vector<8x128xf32>
      %355 = arith.addf %353, %354 : vector<8x128xf32>
      %356 = arith.mulf %355, %341 : vector<8x128xf32>
      %357 = arith.mulf %320, %356 : vector<8x128xf32>
      %c7_109 = arith.constant 7 : index
      %358 = arith.index_cast %4 : i32 to index
      %c0_110 = arith.constant 0 : index
      %359 = vector.load %arg4[%c7_109, %358, %c0_110] : memref<16x32x128xf32, #tpu.memory_space<vmem>>, vector<1x8x128xf32>
      %360 = vector.shape_cast %359 : vector<1x8x128xf32> to vector<8x128xf32>
      %361 = vector.shape_cast %357 : vector<8x128xf32> to vector<1x8x128xf32>
      tpu.vector_store %arg4[%c7_109, %358, %c0_110], %361 {strides = array<i32>} : memref<16x32x128xf32, #tpu.memory_space<vmem>>, vector<1x8x128xf32>,
      %362 = arith.mulf %319, %84 : vector<8x128xf32>
      %c5_111 = arith.constant 5 : index
      %363 = memref.load %arg3[%c5_111] : memref<16xf32, #tpu.memory_space<smem>>
      %c10 = arith.constant 10 : index
      %364 = memref.load %arg2[%c10] : memref<32xf32, #tpu.memory_space<smem>>
      %365 = vector.broadcast %364 : f32 to vector<8x128xf32>
      %366 = arith.mulf %365, %99 : vector<8x128xf32>
      %367 = vector.broadcast %363 : f32 to vector<8x128xf32>
      %368 = arith.addf %367, %366 : vector<8x128xf32>
      %c11 = arith.constant 11 : index
      %369 = memref.load %arg2[%c11] : memref<32xf32, #tpu.memory_space<smem>>
      %370 = vector.broadcast %369 : f32 to vector<8x128xf32>
      %371 = arith.mulf %370, %102 : vector<8x128xf32>
      %372 = arith.addf %368, %371 : vector<8x128xf32>
      %cst_112 = arith.constant 0.159154937 : f32
      %373 = vector.broadcast %cst_112 : f32 to vector<8x128xf32>
      %374 = arith.mulf %372, %373 : vector<8x128xf32>
      %cst_113 = arith.constant 5.000000e-01 : f32
      %375 = vector.broadcast %cst_113 : f32 to vector<8x128xf32>
      %376 = arith.addf %374, %375 : vector<8x128xf32>
      %377 = math.floor %376 : vector<8x128xf32>
      %cst_114 = arith.constant 6.281250e+00 : f32
      %378 = vector.broadcast %cst_114 : f32 to vector<8x128xf32>
      %379 = arith.mulf %377, %378 : vector<8x128xf32>
      %380 = arith.subf %372, %379 : vector<8x128xf32>
      %cst_115 = arith.constant 0.00193530717 : f32
      %381 = vector.broadcast %cst_115 : f32 to vector<8x128xf32>
      %382 = arith.mulf %377, %381 : vector<8x128xf32>
      %383 = arith.subf %380, %382 : vector<8x128xf32>
      %384 = arith.mulf %383, %383 : vector<8x128xf32>
      %cst_116 = arith.constant 2.1470546E-6 : f32
      %385 = vector.broadcast %cst_116 : f32 to vector<8x128xf32>
      %386 = arith.mulf %385, %384 : vector<8x128xf32>
      %cst_117 = arith.constant -1.92631793E-4 : f32
      %387 = vector.broadcast %cst_117 : f32 to vector<8x128xf32>
      %388 = arith.addf %386, %387 : vector<8x128xf32>
      %389 = arith.mulf %388, %384 : vector<8x128xf32>
      %cst_118 = arith.constant 8.308850e-03 : f32
      %390 = vector.broadcast %cst_118 : f32 to vector<8x128xf32>
      %391 = arith.addf %389, %390 : vector<8x128xf32>
      %392 = arith.mulf %391, %384 : vector<8x128xf32>
      %cst_119 = arith.constant -0.16662401 : f32
      %393 = vector.broadcast %cst_119 : f32 to vector<8x128xf32>
      %394 = arith.addf %392, %393 : vector<8x128xf32>
      %395 = arith.mulf %394, %384 : vector<8x128xf32>
      %cst_120 = arith.constant 0.999979138 : f32
      %396 = vector.broadcast %cst_120 : f32 to vector<8x128xf32>
      %397 = arith.addf %395, %396 : vector<8x128xf32>
      %398 = arith.mulf %397, %383 : vector<8x128xf32>
      %399 = arith.mulf %362, %398 : vector<8x128xf32>
      %c5_121 = arith.constant 5 : index
      %400 = arith.index_cast %4 : i32 to index
      %c0_122 = arith.constant 0 : index
      %401 = vector.load %arg4[%c5_121, %400, %c0_122] : memref<16x32x128xf32, #tpu.memory_space<vmem>>, vector<1x8x128xf32>
      %402 = vector.shape_cast %401 : vector<1x8x128xf32> to vector<8x128xf32>
      %403 = vector.shape_cast %399 : vector<8x128xf32> to vector<1x8x128xf32>
      tpu.vector_store %arg4[%c5_121, %400, %c0_122], %403 {strides = array<i32>} : memref<16x32x128xf32, #tpu.memory_space<vmem>>, vector<1x8x128xf32>,
      %cst_123 = arith.constant 0.1820914 : f32
      %404 = vector.broadcast %cst_123 : f32 to vector<8x128xf32>
      %405 = arith.mulf %404, %40 : vector<8x128xf32>
      %406 = arith.mulf %405, %87 : vector<8x128xf32>
      %c8 = arith.constant 8 : index
      %407 = memref.load %arg3[%c8] : memref<16xf32, #tpu.memory_space<smem>>
      %c16 = arith.constant 16 : index
      %408 = memref.load %arg2[%c16] : memref<32xf32, #tpu.memory_space<smem>>
      %409 = vector.broadcast %408 : f32 to vector<8x128xf32>
      %410 = arith.mulf %409, %99 : vector<8x128xf32>
      %411 = vector.broadcast %407 : f32 to vector<8x128xf32>
      %412 = arith.addf %411, %410 : vector<8x128xf32>
      %c17 = arith.constant 17 : index
      %413 = memref.load %arg2[%c17] : memref<32xf32, #tpu.memory_space<smem>>
      %414 = vector.broadcast %413 : f32 to vector<8x128xf32>
      %415 = arith.mulf %414, %102 : vector<8x128xf32>
      %416 = arith.addf %412, %415 : vector<8x128xf32>
      %cst_124 = arith.constant 0.159154937 : f32
      %417 = vector.broadcast %cst_124 : f32 to vector<8x128xf32>
      %418 = arith.mulf %416, %417 : vector<8x128xf32>
      %cst_125 = arith.constant 5.000000e-01 : f32
      %419 = vector.broadcast %cst_125 : f32 to vector<8x128xf32>
      %420 = arith.addf %418, %419 : vector<8x128xf32>
      %421 = math.floor %420 : vector<8x128xf32>
      %cst_126 = arith.constant 6.281250e+00 : f32
      %422 = vector.broadcast %cst_126 : f32 to vector<8x128xf32>
      %423 = arith.mulf %421, %422 : vector<8x128xf32>
      %424 = arith.subf %416, %423 : vector<8x128xf32>
      %cst_127 = arith.constant 0.00193530717 : f32
      %425 = vector.broadcast %cst_127 : f32 to vector<8x128xf32>
      %426 = arith.mulf %421, %425 : vector<8x128xf32>
      %427 = arith.subf %424, %426 : vector<8x128xf32>
      %428 = arith.mulf %427, %427 : vector<8x128xf32>
      %cst_128 = arith.constant 2.1470546E-6 : f32
      %429 = vector.broadcast %cst_128 : f32 to vector<8x128xf32>
      %430 = arith.mulf %429, %428 : vector<8x128xf32>
      %cst_129 = arith.constant -1.92631793E-4 : f32
      %431 = vector.broadcast %cst_129 : f32 to vector<8x128xf32>
      %432 = arith.addf %430, %431 : vector<8x128xf32>
      %433 = arith.mulf %432, %428 : vector<8x128xf32>
      %cst_130 = arith.constant 8.308850e-03 : f32
      %434 = vector.broadcast %cst_130 : f32 to vector<8x128xf32>
      %435 = arith.addf %433, %434 : vector<8x128xf32>
      %436 = arith.mulf %435, %428 : vector<8x128xf32>
      %cst_131 = arith.constant -0.16662401 : f32
      %437 = vector.broadcast %cst_131 : f32 to vector<8x128xf32>
      %438 = arith.addf %436, %437 : vector<8x128xf32>
      %439 = arith.mulf %438, %428 : vector<8x128xf32>
      %cst_132 = arith.constant 0.999979138 : f32
      %440 = vector.broadcast %cst_132 : f32 to vector<8x128xf32>
      %441 = arith.addf %439, %440 : vector<8x128xf32>
      %442 = arith.mulf %441, %427 : vector<8x128xf32>
      %443 = arith.mulf %406, %442 : vector<8x128xf32>
      %c8_133 = arith.constant 8 : index
      %444 = arith.index_cast %4 : i32 to index
      %c0_134 = arith.constant 0 : index
      %445 = vector.load %arg4[%c8_133, %444, %c0_134] : memref<16x32x128xf32, #tpu.memory_space<vmem>>, vector<1x8x128xf32>
      %446 = vector.shape_cast %445 : vector<1x8x128xf32> to vector<8x128xf32>
      %447 = vector.shape_cast %443 : vector<8x128xf32> to vector<1x8x128xf32>
      tpu.vector_store %arg4[%c8_133, %444, %c0_134], %447 {strides = array<i32>} : memref<16x32x128xf32, #tpu.memory_space<vmem>>, vector<1x8x128xf32>,
      %448 = arith.mulf %405, %90 : vector<8x128xf32>
      %c4_135 = arith.constant 4 : index
      %449 = memref.load %arg3[%c4_135] : memref<16xf32, #tpu.memory_space<smem>>
      %c8_136 = arith.constant 8 : index
      %450 = memref.load %arg2[%c8_136] : memref<32xf32, #tpu.memory_space<smem>>
      %451 = vector.broadcast %450 : f32 to vector<8x128xf32>
      %452 = arith.mulf %451, %99 : vector<8x128xf32>
      %453 = vector.broadcast %449 : f32 to vector<8x128xf32>
      %454 = arith.addf %453, %452 : vector<8x128xf32>
      %c9 = arith.constant 9 : index
      %455 = memref.load %arg2[%c9] : memref<32xf32, #tpu.memory_space<smem>>
      %456 = vector.broadcast %455 : f32 to vector<8x128xf32>
      %457 = arith.mulf %456, %102 : vector<8x128xf32>
      %458 = arith.addf %454, %457 : vector<8x128xf32>
      %cst_137 = arith.constant 0.159154937 : f32
      %459 = vector.broadcast %cst_137 : f32 to vector<8x128xf32>
      %460 = arith.mulf %458, %459 : vector<8x128xf32>
      %cst_138 = arith.constant 5.000000e-01 : f32
      %461 = vector.broadcast %cst_138 : f32 to vector<8x128xf32>
      %462 = arith.addf %460, %461 : vector<8x128xf32>
      %463 = math.floor %462 : vector<8x128xf32>
      %cst_139 = arith.constant 6.281250e+00 : f32
      %464 = vector.broadcast %cst_139 : f32 to vector<8x128xf32>
      %465 = arith.mulf %463, %464 : vector<8x128xf32>
      %466 = arith.subf %458, %465 : vector<8x128xf32>
      %cst_140 = arith.constant 0.00193530717 : f32
      %467 = vector.broadcast %cst_140 : f32 to vector<8x128xf32>
      %468 = arith.mulf %463, %467 : vector<8x128xf32>
      %469 = arith.subf %466, %468 : vector<8x128xf32>
      %470 = arith.mulf %469, %469 : vector<8x128xf32>
      %cst_141 = arith.constant 2.1470546E-6 : f32
      %471 = vector.broadcast %cst_141 : f32 to vector<8x128xf32>
      %472 = arith.mulf %471, %470 : vector<8x128xf32>
      %cst_142 = arith.constant -1.92631793E-4 : f32
      %473 = vector.broadcast %cst_142 : f32 to vector<8x128xf32>
      %474 = arith.addf %472, %473 : vector<8x128xf32>
      %475 = arith.mulf %474, %470 : vector<8x128xf32>
      %cst_143 = arith.constant 8.308850e-03 : f32
      %476 = vector.broadcast %cst_143 : f32 to vector<8x128xf32>
      %477 = arith.addf %475, %476 : vector<8x128xf32>
      %478 = arith.mulf %477, %470 : vector<8x128xf32>
      %cst_144 = arith.constant -0.16662401 : f32
      %479 = vector.broadcast %cst_144 : f32 to vector<8x128xf32>
      %480 = arith.addf %478, %479 : vector<8x128xf32>
      %481 = arith.mulf %480, %470 : vector<8x128xf32>
      %cst_145 = arith.constant 0.999979138 : f32
      %482 = vector.broadcast %cst_145 : f32 to vector<8x128xf32>
      %483 = arith.addf %481, %482 : vector<8x128xf32>
      %484 = arith.mulf %483, %469 : vector<8x128xf32>
      %485 = arith.mulf %448, %484 : vector<8x128xf32>
      %c4_146 = arith.constant 4 : index
      %486 = arith.index_cast %4 : i32 to index
      %c0_147 = arith.constant 0 : index
      %487 = vector.load %arg4[%c4_146, %486, %c0_147] : memref<16x32x128xf32, #tpu.memory_space<vmem>>, vector<1x8x128xf32>
      %488 = vector.shape_cast %487 : vector<1x8x128xf32> to vector<8x128xf32>
      %489 = vector.shape_cast %485 : vector<8x128xf32> to vector<1x8x128xf32>
      tpu.vector_store %arg4[%c4_146, %486, %c0_147], %489 {strides = array<i32>} : memref<16x32x128xf32, #tpu.memory_space<vmem>>, vector<1x8x128xf32>,
      %cst_148 = arith.constant 0.746352672 : f32
      %490 = vector.broadcast %cst_148 : f32 to vector<8x128xf32>
      %491 = arith.mulf %490, %68 : vector<8x128xf32>
      %c12_149 = arith.constant 12 : index
      %492 = memref.load %arg3[%c12_149] : memref<16xf32, #tpu.memory_space<smem>>
      %c24 = arith.constant 24 : index
      %493 = memref.load %arg2[%c24] : memref<32xf32, #tpu.memory_space<smem>>
      %494 = vector.broadcast %493 : f32 to vector<8x128xf32>
      %495 = arith.mulf %494, %99 : vector<8x128xf32>
      %496 = vector.broadcast %492 : f32 to vector<8x128xf32>
      %497 = arith.addf %496, %495 : vector<8x128xf32>
      %c25 = arith.constant 25 : index
      %498 = memref.load %arg2[%c25] : memref<32xf32, #tpu.memory_space<smem>>
      %499 = vector.broadcast %498 : f32 to vector<8x128xf32>
      %500 = arith.mulf %499, %102 : vector<8x128xf32>
      %501 = arith.addf %497, %500 : vector<8x128xf32>
      %cst_150 = arith.constant 0.159154937 : f32
      %502 = vector.broadcast %cst_150 : f32 to vector<8x128xf32>
      %503 = arith.mulf %501, %502 : vector<8x128xf32>
      %cst_151 = arith.constant 5.000000e-01 : f32
      %504 = vector.broadcast %cst_151 : f32 to vector<8x128xf32>
      %505 = arith.addf %503, %504 : vector<8x128xf32>
      %506 = math.floor %505 : vector<8x128xf32>
      %cst_152 = arith.constant 6.281250e+00 : f32
      %507 = vector.broadcast %cst_152 : f32 to vector<8x128xf32>
      %508 = arith.mulf %506, %507 : vector<8x128xf32>
      %509 = arith.subf %501, %508 : vector<8x128xf32>
      %cst_153 = arith.constant 0.00193530717 : f32
      %510 = vector.broadcast %cst_153 : f32 to vector<8x128xf32>
      %511 = arith.mulf %506, %510 : vector<8x128xf32>
      %512 = arith.subf %509, %511 : vector<8x128xf32>
      %513 = arith.mulf %512, %512 : vector<8x128xf32>
      %cst_154 = arith.constant 2.1470546E-6 : f32
      %514 = vector.broadcast %cst_154 : f32 to vector<8x128xf32>
      %515 = arith.mulf %514, %513 : vector<8x128xf32>
      %cst_155 = arith.constant -1.92631793E-4 : f32
      %516 = vector.broadcast %cst_155 : f32 to vector<8x128xf32>
      %517 = arith.addf %515, %516 : vector<8x128xf32>
      %518 = arith.mulf %517, %513 : vector<8x128xf32>
      %cst_156 = arith.constant 8.308850e-03 : f32
      %519 = vector.broadcast %cst_156 : f32 to vector<8x128xf32>
      %520 = arith.addf %518, %519 : vector<8x128xf32>
      %521 = arith.mulf %520, %513 : vector<8x128xf32>
      %cst_157 = arith.constant -0.16662401 : f32
      %522 = vector.broadcast %cst_157 : f32 to vector<8x128xf32>
      %523 = arith.addf %521, %522 : vector<8x128xf32>
      %524 = arith.mulf %523, %513 : vector<8x128xf32>
      %cst_158 = arith.constant 0.999979138 : f32
      %525 = vector.broadcast %cst_158 : f32 to vector<8x128xf32>
      %526 = arith.addf %524, %525 : vector<8x128xf32>
      %527 = arith.mulf %526, %512 : vector<8x128xf32>
      %528 = arith.mulf %491, %527 : vector<8x128xf32>
      %c12_159 = arith.constant 12 : index
      %529 = arith.index_cast %4 : i32 to index
      %c0_160 = arith.constant 0 : index
      %530 = vector.load %arg4[%c12_159, %529, %c0_160] : memref<16x32x128xf32, #tpu.memory_space<vmem>>, vector<1x8x128xf32>
      %531 = vector.shape_cast %530 : vector<1x8x128xf32> to vector<8x128xf32>
      %532 = vector.shape_cast %528 : vector<8x128xf32> to vector<1x8x128xf32>
      tpu.vector_store %arg4[%c12_159, %529, %c0_160], %532 {strides = array<i32>} : memref<16x32x128xf32, #tpu.memory_space<vmem>>, vector<1x8x128xf32>,
      %cst_161 = arith.constant 0.304697186 : f32
      %533 = vector.broadcast %cst_161 : f32 to vector<8x128xf32>
      %534 = arith.mulf %533, %76 : vector<8x128xf32>
      %535 = arith.mulf %534, %81 : vector<8x128xf32>
      %c13_162 = arith.constant 13 : index
      %536 = memref.load %arg3[%c13_162] : memref<16xf32, #tpu.memory_space<smem>>
      %c26 = arith.constant 26 : index
      %537 = memref.load %arg2[%c26] : memref<32xf32, #tpu.memory_space<smem>>
      %538 = vector.broadcast %537 : f32 to vector<8x128xf32>
      %539 = arith.mulf %538, %99 : vector<8x128xf32>
      %540 = vector.broadcast %536 : f32 to vector<8x128xf32>
      %541 = arith.addf %540, %539 : vector<8x128xf32>
      %c27 = arith.constant 27 : index
      %542 = memref.load %arg2[%c27] : memref<32xf32, #tpu.memory_space<smem>>
      %543 = vector.broadcast %542 : f32 to vector<8x128xf32>
      %544 = arith.mulf %543, %102 : vector<8x128xf32>
      %545 = arith.addf %541, %544 : vector<8x128xf32>
      %cst_163 = arith.constant 0.159154937 : f32
      %546 = vector.broadcast %cst_163 : f32 to vector<8x128xf32>
      %547 = arith.mulf %545, %546 : vector<8x128xf32>
      %cst_164 = arith.constant 5.000000e-01 : f32
      %548 = vector.broadcast %cst_164 : f32 to vector<8x128xf32>
      %549 = arith.addf %547, %548 : vector<8x128xf32>
      %550 = math.floor %549 : vector<8x128xf32>
      %cst_165 = arith.constant 6.281250e+00 : f32
      %551 = vector.broadcast %cst_165 : f32 to vector<8x128xf32>
      %552 = arith.mulf %550, %551 : vector<8x128xf32>
      %553 = arith.subf %545, %552 : vector<8x128xf32>
      %cst_166 = arith.constant 0.00193530717 : f32
      %554 = vector.broadcast %cst_166 : f32 to vector<8x128xf32>
      %555 = arith.mulf %550, %554 : vector<8x128xf32>
      %556 = arith.subf %553, %555 : vector<8x128xf32>
      %557 = arith.mulf %556, %556 : vector<8x128xf32>
      %cst_167 = arith.constant 2.1470546E-6 : f32
      %558 = vector.broadcast %cst_167 : f32 to vector<8x128xf32>
      %559 = arith.mulf %558, %557 : vector<8x128xf32>
      %cst_168 = arith.constant -1.92631793E-4 : f32
      %560 = vector.broadcast %cst_168 : f32 to vector<8x128xf32>
      %561 = arith.addf %559, %560 : vector<8x128xf32>
      %562 = arith.mulf %561, %557 : vector<8x128xf32>
      %cst_169 = arith.constant 8.308850e-03 : f32
      %563 = vector.broadcast %cst_169 : f32 to vector<8x128xf32>
      %564 = arith.addf %562, %563 : vector<8x128xf32>
      %565 = arith.mulf %564, %557 : vector<8x128xf32>
      %cst_170 = arith.constant -0.16662401 : f32
      %566 = vector.broadcast %cst_170 : f32 to vector<8x128xf32>
      %567 = arith.addf %565, %566 : vector<8x128xf32>
      %568 = arith.mulf %567, %557 : vector<8x128xf32>
      %cst_171 = arith.constant 0.999979138 : f32
      %569 = vector.broadcast %cst_171 : f32 to vector<8x128xf32>
      %570 = arith.addf %568, %569 : vector<8x128xf32>
      %571 = arith.mulf %570, %556 : vector<8x128xf32>
      %572 = arith.mulf %535, %571 : vector<8x128xf32>
      %c13_172 = arith.constant 13 : index
      %573 = arith.index_cast %4 : i32 to index
      %c0_173 = arith.constant 0 : index
      %574 = vector.load %arg4[%c13_172, %573, %c0_173] : memref<16x32x128xf32, #tpu.memory_space<vmem>>, vector<1x8x128xf32>
      %575 = vector.shape_cast %574 : vector<1x8x128xf32> to vector<8x128xf32>
      %576 = vector.shape_cast %572 : vector<8x128xf32> to vector<1x8x128xf32>
      tpu.vector_store %arg4[%c13_172, %573, %c0_173], %576 {strides = array<i32>} : memref<16x32x128xf32, #tpu.memory_space<vmem>>, vector<1x8x128xf32>,
      %577 = arith.mulf %534, %84 : vector<8x128xf32>
      %c11_174 = arith.constant 11 : index
      %578 = memref.load %arg3[%c11_174] : memref<16xf32, #tpu.memory_space<smem>>
      %c22 = arith.constant 22 : index
      %579 = memref.load %arg2[%c22] : memref<32xf32, #tpu.memory_space<smem>>
      %580 = vector.broadcast %579 : f32 to vector<8x128xf32>
      %581 = arith.mulf %580, %99 : vector<8x128xf32>
      %582 = vector.broadcast %578 : f32 to vector<8x128xf32>
      %583 = arith.addf %582, %581 : vector<8x128xf32>
      %c23 = arith.constant 23 : index
      %584 = memref.load %arg2[%c23] : memref<32xf32, #tpu.memory_space<smem>>
      %585 = vector.broadcast %584 : f32 to vector<8x128xf32>
      %586 = arith.mulf %585, %102 : vector<8x128xf32>
      %587 = arith.addf %583, %586 : vector<8x128xf32>
      %cst_175 = arith.constant 0.159154937 : f32
      %588 = vector.broadcast %cst_175 : f32 to vector<8x128xf32>
      %589 = arith.mulf %587, %588 : vector<8x128xf32>
      %cst_176 = arith.constant 5.000000e-01 : f32
      %590 = vector.broadcast %cst_176 : f32 to vector<8x128xf32>
      %591 = arith.addf %589, %590 : vector<8x128xf32>
      %592 = math.floor %591 : vector<8x128xf32>
      %cst_177 = arith.constant 6.281250e+00 : f32
      %593 = vector.broadcast %cst_177 : f32 to vector<8x128xf32>
      %594 = arith.mulf %592, %593 : vector<8x128xf32>
      %595 = arith.subf %587, %594 : vector<8x128xf32>
      %cst_178 = arith.constant 0.00193530717 : f32
      %596 = vector.broadcast %cst_178 : f32 to vector<8x128xf32>
      %597 = arith.mulf %592, %596 : vector<8x128xf32>
      %598 = arith.subf %595, %597 : vector<8x128xf32>
      %599 = arith.mulf %598, %598 : vector<8x128xf32>
      %cst_179 = arith.constant 2.1470546E-6 : f32
      %600 = vector.broadcast %cst_179 : f32 to vector<8x128xf32>
      %601 = arith.mulf %600, %599 : vector<8x128xf32>
      %cst_180 = arith.constant -1.92631793E-4 : f32
      %602 = vector.broadcast %cst_180 : f32 to vector<8x128xf32>
      %603 = arith.addf %601, %602 : vector<8x128xf32>
      %604 = arith.mulf %603, %599 : vector<8x128xf32>
      %cst_181 = arith.constant 8.308850e-03 : f32
      %605 = vector.broadcast %cst_181 : f32 to vector<8x128xf32>
      %606 = arith.addf %604, %605 : vector<8x128xf32>
      %607 = arith.mulf %606, %599 : vector<8x128xf32>
      %cst_182 = arith.constant -0.16662401 : f32
      %608 = vector.broadcast %cst_182 : f32 to vector<8x128xf32>
      %609 = arith.addf %607, %608 : vector<8x128xf32>
      %610 = arith.mulf %609, %599 : vector<8x128xf32>
      %cst_183 = arith.constant 0.999979138 : f32
      %611 = vector.broadcast %cst_183 : f32 to vector<8x128xf32>
      %612 = arith.addf %610, %611 : vector<8x128xf32>
      %613 = arith.mulf %612, %598 : vector<8x128xf32>
      %614 = arith.mulf %577, %613 : vector<8x128xf32>
      %c11_184 = arith.constant 11 : index
      %615 = arith.index_cast %4 : i32 to index
      %c0_185 = arith.constant 0 : index
      %616 = vector.load %arg4[%c11_184, %615, %c0_185] : memref<16x32x128xf32, #tpu.memory_space<vmem>>, vector<1x8x128xf32>
      %617 = vector.shape_cast %616 : vector<1x8x128xf32> to vector<8x128xf32>
      %618 = vector.shape_cast %614 : vector<8x128xf32> to vector<1x8x128xf32>
      tpu.vector_store %arg4[%c11_184, %615, %c0_185], %618 {strides = array<i32>} : memref<16x32x128xf32, #tpu.memory_space<vmem>>, vector<1x8x128xf32>,
      %cst_186 = arith.constant 0.0963537171 : f32
      %619 = vector.broadcast %cst_186 : f32 to vector<8x128xf32>
      %620 = arith.mulf %619, %52 : vector<8x128xf32>
      %621 = arith.mulf %620, %87 : vector<8x128xf32>
      %c14_187 = arith.constant 14 : index
      %622 = memref.load %arg3[%c14_187] : memref<16xf32, #tpu.memory_space<smem>>
      %c28 = arith.constant 28 : index
      %623 = memref.load %arg2[%c28] : memref<32xf32, #tpu.memory_space<smem>>
      %624 = vector.broadcast %623 : f32 to vector<8x128xf32>
      %625 = arith.mulf %624, %99 : vector<8x128xf32>
      %626 = vector.broadcast %622 : f32 to vector<8x128xf32>
      %627 = arith.addf %626, %625 : vector<8x128xf32>
      %c29 = arith.constant 29 : index
      %628 = memref.load %arg2[%c29] : memref<32xf32, #tpu.memory_space<smem>>
      %629 = vector.broadcast %628 : f32 to vector<8x128xf32>
      %630 = arith.mulf %629, %102 : vector<8x128xf32>
      %631 = arith.addf %627, %630 : vector<8x128xf32>
      %cst_188 = arith.constant 0.159154937 : f32
      %632 = vector.broadcast %cst_188 : f32 to vector<8x128xf32>
      %633 = arith.mulf %631, %632 : vector<8x128xf32>
      %cst_189 = arith.constant 5.000000e-01 : f32
      %634 = vector.broadcast %cst_189 : f32 to vector<8x128xf32>
      %635 = arith.addf %633, %634 : vector<8x128xf32>
      %636 = math.floor %635 : vector<8x128xf32>
      %cst_190 = arith.constant 6.281250e+00 : f32
      %637 = vector.broadcast %cst_190 : f32 to vector<8x128xf32>
      %638 = arith.mulf %636, %637 : vector<8x128xf32>
      %639 = arith.subf %631, %638 : vector<8x128xf32>
      %cst_191 = arith.constant 0.00193530717 : f32
      %640 = vector.broadcast %cst_191 : f32 to vector<8x128xf32>
      %641 = arith.mulf %636, %640 : vector<8x128xf32>
      %642 = arith.subf %639, %641 : vector<8x128xf32>
      %643 = arith.mulf %642, %642 : vector<8x128xf32>
      %cst_192 = arith.constant 2.1470546E-6 : f32
      %644 = vector.broadcast %cst_192 : f32 to vector<8x128xf32>
      %645 = arith.mulf %644, %643 : vector<8x128xf32>
      %cst_193 = arith.constant -1.92631793E-4 : f32
      %646 = vector.broadcast %cst_193 : f32 to vector<8x128xf32>
      %647 = arith.addf %645, %646 : vector<8x128xf32>
      %648 = arith.mulf %647, %643 : vector<8x128xf32>
      %cst_194 = arith.constant 8.308850e-03 : f32
      %649 = vector.broadcast %cst_194 : f32 to vector<8x128xf32>
      %650 = arith.addf %648, %649 : vector<8x128xf32>
      %651 = arith.mulf %650, %643 : vector<8x128xf32>
      %cst_195 = arith.constant -0.16662401 : f32
      %652 = vector.broadcast %cst_195 : f32 to vector<8x128xf32>
      %653 = arith.addf %651, %652 : vector<8x128xf32>
      %654 = arith.mulf %653, %643 : vector<8x128xf32>
      %cst_196 = arith.constant 0.999979138 : f32
      %655 = vector.broadcast %cst_196 : f32 to vector<8x128xf32>
      %656 = arith.addf %654, %655 : vector<8x128xf32>
      %657 = arith.mulf %656, %642 : vector<8x128xf32>
      %658 = arith.mulf %621, %657 : vector<8x128xf32>
      %c14_197 = arith.constant 14 : index
      %659 = arith.index_cast %4 : i32 to index
      %c0_198 = arith.constant 0 : index
      %660 = vector.load %arg4[%c14_197, %659, %c0_198] : memref<16x32x128xf32, #tpu.memory_space<vmem>>, vector<1x8x128xf32>
      %661 = vector.shape_cast %660 : vector<1x8x128xf32> to vector<8x128xf32>
      %662 = vector.shape_cast %658 : vector<8x128xf32> to vector<1x8x128xf32>
      tpu.vector_store %arg4[%c14_197, %659, %c0_198], %662 {strides = array<i32>} : memref<16x32x128xf32, #tpu.memory_space<vmem>>, vector<1x8x128xf32>,
      %663 = arith.mulf %620, %90 : vector<8x128xf32>
      %c10_199 = arith.constant 10 : index
      %664 = memref.load %arg3[%c10_199] : memref<16xf32, #tpu.memory_space<smem>>
      %c20 = arith.constant 20 : index
      %665 = memref.load %arg2[%c20] : memref<32xf32, #tpu.memory_space<smem>>
      %666 = vector.broadcast %665 : f32 to vector<8x128xf32>
      %667 = arith.mulf %666, %99 : vector<8x128xf32>
      %668 = vector.broadcast %664 : f32 to vector<8x128xf32>
      %669 = arith.addf %668, %667 : vector<8x128xf32>
      %c21 = arith.constant 21 : index
      %670 = memref.load %arg2[%c21] : memref<32xf32, #tpu.memory_space<smem>>
      %671 = vector.broadcast %670 : f32 to vector<8x128xf32>
      %672 = arith.mulf %671, %102 : vector<8x128xf32>
      %673 = arith.addf %669, %672 : vector<8x128xf32>
      %cst_200 = arith.constant 0.159154937 : f32
      %674 = vector.broadcast %cst_200 : f32 to vector<8x128xf32>
      %675 = arith.mulf %673, %674 : vector<8x128xf32>
      %cst_201 = arith.constant 5.000000e-01 : f32
      %676 = vector.broadcast %cst_201 : f32 to vector<8x128xf32>
      %677 = arith.addf %675, %676 : vector<8x128xf32>
      %678 = math.floor %677 : vector<8x128xf32>
      %cst_202 = arith.constant 6.281250e+00 : f32
      %679 = vector.broadcast %cst_202 : f32 to vector<8x128xf32>
      %680 = arith.mulf %678, %679 : vector<8x128xf32>
      %681 = arith.subf %673, %680 : vector<8x128xf32>
      %cst_203 = arith.constant 0.00193530717 : f32
      %682 = vector.broadcast %cst_203 : f32 to vector<8x128xf32>
      %683 = arith.mulf %678, %682 : vector<8x128xf32>
      %684 = arith.subf %681, %683 : vector<8x128xf32>
      %685 = arith.mulf %684, %684 : vector<8x128xf32>
      %cst_204 = arith.constant 2.1470546E-6 : f32
      %686 = vector.broadcast %cst_204 : f32 to vector<8x128xf32>
      %687 = arith.mulf %686, %685 : vector<8x128xf32>
      %cst_205 = arith.constant -1.92631793E-4 : f32
      %688 = vector.broadcast %cst_205 : f32 to vector<8x128xf32>
      %689 = arith.addf %687, %688 : vector<8x128xf32>
      %690 = arith.mulf %689, %685 : vector<8x128xf32>
      %cst_206 = arith.constant 8.308850e-03 : f32
      %691 = vector.broadcast %cst_206 : f32 to vector<8x128xf32>
      %692 = arith.addf %690, %691 : vector<8x128xf32>
      %693 = arith.mulf %692, %685 : vector<8x128xf32>
      %cst_207 = arith.constant -0.16662401 : f32
      %694 = vector.broadcast %cst_207 : f32 to vector<8x128xf32>
      %695 = arith.addf %693, %694 : vector<8x128xf32>
      %696 = arith.mulf %695, %685 : vector<8x128xf32>
      %cst_208 = arith.constant 0.999979138 : f32
      %697 = vector.broadcast %cst_208 : f32 to vector<8x128xf32>
      %698 = arith.addf %696, %697 : vector<8x128xf32>
      %699 = arith.mulf %698, %684 : vector<8x128xf32>
      %700 = arith.mulf %663, %699 : vector<8x128xf32>
      %c10_209 = arith.constant 10 : index
      %701 = arith.index_cast %4 : i32 to index
      %c0_210 = arith.constant 0 : index
      %702 = vector.load %arg4[%c10_209, %701, %c0_210] : memref<16x32x128xf32, #tpu.memory_space<vmem>>, vector<1x8x128xf32>
      %703 = vector.shape_cast %702 : vector<1x8x128xf32> to vector<8x128xf32>
      %704 = vector.shape_cast %700 : vector<8x128xf32> to vector<1x8x128xf32>
      tpu.vector_store %arg4[%c10_209, %701, %c0_210], %704 {strides = array<i32>} : memref<16x32x128xf32, #tpu.memory_space<vmem>>, vector<1x8x128xf32>,
      %cst_211 = arith.constant 0.0393362381 : f32
      %705 = vector.broadcast %cst_211 : f32 to vector<8x128xf32>
      %706 = arith.mulf %705, %43 : vector<8x128xf32>
      %707 = arith.mulf %706, %93 : vector<8x128xf32>
      %c15_212 = arith.constant 15 : index
      %708 = memref.load %arg3[%c15_212] : memref<16xf32, #tpu.memory_space<smem>>
      %c30 = arith.constant 30 : index
      %709 = memref.load %arg2[%c30] : memref<32xf32, #tpu.memory_space<smem>>
      %710 = vector.broadcast %709 : f32 to vector<8x128xf32>
      %711 = arith.mulf %710, %99 : vector<8x128xf32>
      %712 = vector.broadcast %708 : f32 to vector<8x128xf32>
      %713 = arith.addf %712, %711 : vector<8x128xf32>
      %c31 = arith.constant 31 : index
      %714 = memref.load %arg2[%c31] : memref<32xf32, #tpu.memory_space<smem>>
      %715 = vector.broadcast %714 : f32 to vector<8x128xf32>
      %716 = arith.mulf %715, %102 : vector<8x128xf32>
      %717 = arith.addf %713, %716 : vector<8x128xf32>
      %cst_213 = arith.constant 0.159154937 : f32
      %718 = vector.broadcast %cst_213 : f32 to vector<8x128xf32>
      %719 = arith.mulf %717, %718 : vector<8x128xf32>
      %cst_214 = arith.constant 5.000000e-01 : f32
      %720 = vector.broadcast %cst_214 : f32 to vector<8x128xf32>
      %721 = arith.addf %719, %720 : vector<8x128xf32>
      %722 = math.floor %721 : vector<8x128xf32>
      %cst_215 = arith.constant 6.281250e+00 : f32
      %723 = vector.broadcast %cst_215 : f32 to vector<8x128xf32>
      %724 = arith.mulf %722, %723 : vector<8x128xf32>
      %725 = arith.subf %717, %724 : vector<8x128xf32>
      %cst_216 = arith.constant 0.00193530717 : f32
      %726 = vector.broadcast %cst_216 : f32 to vector<8x128xf32>
      %727 = arith.mulf %722, %726 : vector<8x128xf32>
      %728 = arith.subf %725, %727 : vector<8x128xf32>
      %729 = arith.mulf %728, %728 : vector<8x128xf32>
      %cst_217 = arith.constant 2.1470546E-6 : f32
      %730 = vector.broadcast %cst_217 : f32 to vector<8x128xf32>
      %731 = arith.mulf %730, %729 : vector<8x128xf32>
      %cst_218 = arith.constant -1.92631793E-4 : f32
      %732 = vector.broadcast %cst_218 : f32 to vector<8x128xf32>
      %733 = arith.addf %731, %732 : vector<8x128xf32>
      %734 = arith.mulf %733, %729 : vector<8x128xf32>
      %cst_219 = arith.constant 8.308850e-03 : f32
      %735 = vector.broadcast %cst_219 : f32 to vector<8x128xf32>
      %736 = arith.addf %734, %735 : vector<8x128xf32>
      %737 = arith.mulf %736, %729 : vector<8x128xf32>
      %cst_220 = arith.constant -0.16662401 : f32
      %738 = vector.broadcast %cst_220 : f32 to vector<8x128xf32>
      %739 = arith.addf %737, %738 : vector<8x128xf32>
      %740 = arith.mulf %739, %729 : vector<8x128xf32>
      %cst_221 = arith.constant 0.999979138 : f32
      %741 = vector.broadcast %cst_221 : f32 to vector<8x128xf32>
      %742 = arith.addf %740, %741 : vector<8x128xf32>
      %743 = arith.mulf %742, %728 : vector<8x128xf32>
      %744 = arith.mulf %707, %743 : vector<8x128xf32>
      %c15_222 = arith.constant 15 : index
      %745 = arith.index_cast %4 : i32 to index
      %c0_223 = arith.constant 0 : index
      %746 = vector.load %arg4[%c15_222, %745, %c0_223] : memref<16x32x128xf32, #tpu.memory_space<vmem>>, vector<1x8x128xf32>
      %747 = vector.shape_cast %746 : vector<1x8x128xf32> to vector<8x128xf32>
      %748 = vector.shape_cast %744 : vector<8x128xf32> to vector<1x8x128xf32>
      tpu.vector_store %arg4[%c15_222, %745, %c0_223], %748 {strides = array<i32>} : memref<16x32x128xf32, #tpu.memory_space<vmem>>, vector<1x8x128xf32>,
      %749 = arith.mulf %706, %96 : vector<8x128xf32>
      %c9_224 = arith.constant 9 : index
      %750 = memref.load %arg3[%c9_224] : memref<16xf32, #tpu.memory_space<smem>>
      %c18 = arith.constant 18 : index
      %751 = memref.load %arg2[%c18] : memref<32xf32, #tpu.memory_space<smem>>
      %752 = vector.broadcast %751 : f32 to vector<8x128xf32>
      %753 = arith.mulf %752, %99 : vector<8x128xf32>
      %754 = vector.broadcast %750 : f32 to vector<8x128xf32>
      %755 = arith.addf %754, %753 : vector<8x128xf32>
      %c19 = arith.constant 19 : index
      %756 = memref.load %arg2[%c19] : memref<32xf32, #tpu.memory_space<smem>>
      %757 = vector.broadcast %756 : f32 to vector<8x128xf32>
      %758 = arith.mulf %757, %102 : vector<8x128xf32>
      %759 = arith.addf %755, %758 : vector<8x128xf32>
      %cst_225 = arith.constant 0.159154937 : f32
      %760 = vector.broadcast %cst_225 : f32 to vector<8x128xf32>
      %761 = arith.mulf %759, %760 : vector<8x128xf32>
      %cst_226 = arith.constant 5.000000e-01 : f32
      %762 = vector.broadcast %cst_226 : f32 to vector<8x128xf32>
      %763 = arith.addf %761, %762 : vector<8x128xf32>
      %764 = math.floor %763 : vector<8x128xf32>
      %cst_227 = arith.constant 6.281250e+00 : f32
      %765 = vector.broadcast %cst_227 : f32 to vector<8x128xf32>
      %766 = arith.mulf %764, %765 : vector<8x128xf32>
      %767 = arith.subf %759, %766 : vector<8x128xf32>
      %cst_228 = arith.constant 0.00193530717 : f32
      %768 = vector.broadcast %cst_228 : f32 to vector<8x128xf32>
      %769 = arith.mulf %764, %768 : vector<8x128xf32>
      %770 = arith.subf %767, %769 : vector<8x128xf32>
      %771 = arith.mulf %770, %770 : vector<8x128xf32>
      %cst_229 = arith.constant 2.1470546E-6 : f32
      %772 = vector.broadcast %cst_229 : f32 to vector<8x128xf32>
      %773 = arith.mulf %772, %771 : vector<8x128xf32>
      %cst_230 = arith.constant -1.92631793E-4 : f32
      %774 = vector.broadcast %cst_230 : f32 to vector<8x128xf32>
      %775 = arith.addf %773, %774 : vector<8x128xf32>
      %776 = arith.mulf %775, %771 : vector<8x128xf32>
      %cst_231 = arith.constant 8.308850e-03 : f32
      %777 = vector.broadcast %cst_231 : f32 to vector<8x128xf32>
      %778 = arith.addf %776, %777 : vector<8x128xf32>
      %779 = arith.mulf %778, %771 : vector<8x128xf32>
      %cst_232 = arith.constant -0.16662401 : f32
      %780 = vector.broadcast %cst_232 : f32 to vector<8x128xf32>
      %781 = arith.addf %779, %780 : vector<8x128xf32>
      %782 = arith.mulf %781, %771 : vector<8x128xf32>
      %cst_233 = arith.constant 0.999979138 : f32
      %783 = vector.broadcast %cst_233 : f32 to vector<8x128xf32>
      %784 = arith.addf %782, %783 : vector<8x128xf32>
      %785 = arith.mulf %784, %770 : vector<8x128xf32>
      %786 = arith.mulf %749, %785 : vector<8x128xf32>
      %c9_234 = arith.constant 9 : index
      %787 = arith.index_cast %4 : i32 to index
      %c0_235 = arith.constant 0 : index
      %788 = vector.load %arg4[%c9_234, %787, %c0_235] : memref<16x32x128xf32, #tpu.memory_space<vmem>>, vector<1x8x128xf32>
      %789 = vector.shape_cast %788 : vector<1x8x128xf32> to vector<8x128xf32>
      %790 = vector.shape_cast %786 : vector<8x128xf32> to vector<1x8x128xf32>
      tpu.vector_store %arg4[%c9_234, %787, %c0_235], %790 {strides = array<i32>} : memref<16x32x128xf32, #tpu.memory_space<vmem>>, vector<1x8x128xf32>,
    }
    %c4_i32_0 = arith.constant 4 : i32
    return
  }
  func.func @transform_0(%arg0: i32) -> (i32, i32, i32) {
    %c0_i32 = arith.constant 0 : i32
    %c0_i32_0 = arith.constant 0 : i32
    %c0_i32_1 = arith.constant 0 : i32
    return %c0_i32, %arg0, %c0_i32_0 : i32, i32, i32
  }
  func.func @transform_1(%arg0: i32) -> i32 {
    %c0_i32 = arith.constant 0 : i32
    %c0_i32_0 = arith.constant 0 : i32
    return %c0_i32 : i32
  }
  func.func @transform_2(%arg0: i32) -> i32 {
    %c0_i32 = arith.constant 0 : i32
    %c0_i32_0 = arith.constant 0 : i32
    return %c0_i32 : i32
  }
  func.func @transform_3(%arg0: i32) -> (i32, i32, i32) {
    %c0_i32 = arith.constant 0 : i32
    %c0_i32_0 = arith.constant 0 : i32
    %c0_i32_1 = arith.constant 0 : i32
    return %c0_i32, %arg0, %c0_i32_0 : i32, i32, i32
  }
}

</mosaic_0001>

<bundles_post_ra>
// kernel: spherical_harmonics_layer.1
= control target key start
LH: loop header
LB: loop body
LE: loop exit
PB: predicated region body
PF: predicated region fallthrough
CT: control target
= control target key end

     0   :  { %8 = vsyncpa [#allocation3], 0  ;;  %s1357_s0 = inlined_call_operand.vmem [shape: f32[5,32,128], index: 0, kind: input, shape index: {}]   ;;  %s1358_s1 = inlined_call_operand.vmem [shape: f32[32], index: 1, kind: input, shape index: {}]   ;;  %s1359_s2 = inlined_call_operand.vmem [shape: f32[16], index: 2, kind: input, shape index: {}]   ;;  %s1360_s3 = inlined_call_operand.vmem [shape: f32[16,32,128], index: 3, kind: output, shape index: {}]  }
   0x1   :  { %s17_s14 = sshll.u32 %s1358_s1, 4  ;;  %s18_s14 = int_to_ptr.vmem [resolvable:$true] %s17_s14 }
   0x2   :  { %9 = vsyncpa [#allocation5], 0  ;;  %s26_s17 = sshll.u32 %s1359_s2, 4  ;;  %s870_s18 = smov [#allocation2]   ;;  %s27_s17 = int_to_ptr.vmem [resolvable:$true] %s26_s17 }
   0x3   :  { %20 = dma.vmem_to_smem %s18_s14, 16, %s870_s18, [#allocation3]  }
   0x4   :  { %s871_s19 = smov [#allocation4]  }
   0x5   :  { %29 = dma.vmem_to_smem %s27_s17, 16, %s871_s19, [#allocation5]  }
   0x6   :  { %862 = dma.done.wait [#allocation3], 16  }
   0x7   :  { %863 = vsyncadd [#allocation3], 4294967280 }
   0x8   :  { %864 = dma.done.wait [#allocation5], 16  }
   0x9   :  { %865 = vsyncadd [#allocation5], 4294967280 }
   0xa   :  { %38 = sfence }
   0xb   :  { %s900_s20 = smov 0  }
   0xc LB: > { %s144_s1 = sld [smem:[#allocation4]]  ;;  %s728_s21 = sshll.u32 %s868_s20, 3  ;;  %v872_v0 = vmov 2.0   ;;  %s868_s20 = sphi %s900_s20, %s44_s20  }
   0xd   : > { %s145_s2 = sld [smem:[#allocation2]]  ;;  %s663_s25 = scalar_lea.vmem %s1357_s0, %s728_s21  ;;  %826 = vrcp.f32 %v872_v0 }
   0xe   : > { %s738_s22 = sld [smem:[#allocation2 + $0x1]]  ;;  %v911_v1 = vld [vmem:[%s663_s25 + $0x40] sm:$0xff]  ;;  %s1075_s19 = scalar_lea.vmem %s1360_s3, %s728_s21 }
   0xf   : > { %s913_s26 = sld [smem:[#allocation4 + $0x2]]  ;;  %v915_v2 = vld [vmem:[%s663_s25] sm:$0xff]  ;;  %v55_v5 = vmul.f32 %v911_v1, %v911_v1  ;;  %s44_s20 = sadd.s32 1, %s868_s20  }
  0x10   : > { %v917_v3 = vld [vmem:[%s663_s25 + $0x60] sm:$0xff]  ;;  %s740_s27 = sld [smem:[#allocation2 + $0x4]]  ;;  %p41_p0 = scmp.ge.s32.totalorder %s44_s20, 4  }
  0x11   : > { %v919_v4 = vld [vmem:[%s663_s25 + $0x80] sm:$0xff]  ;;  %v56_v7 = vmul.f32 %v917_v3, %v917_v3  ;;  %s741_s28 = sld [smem:[#allocation2 + $0x5]] }
  0x12   : > { %v923_v6 = vld [vmem:[%s663_s25 + $0x20] sm:$0xff]  ;;  %v58_v8 = vmul.f32 %v919_v4, %v919_v4  ;;  %v148_v10 = vstv %s144_s1  ;;  %s929_s29 = sld [smem:[#allocation4 + $0x3]] }
  0x13   : > { %v146_v9 = vstv %s145_s2  ;;  %v932_v13 = vadd.f32 %v56_v7, %v55_v5  ;;  %s745_s30 = sld [smem:[#allocation2 + $0x6]]  ;;  %v934_v14 = vpop.eup %826 }
  0x14   : > { %v147_v11 = vmul.f32 %v146_v9, %v915_v2  ;;  %v151_v12 = vstv %s738_s22  ;;  %s746_s4 = sld [smem:[#allocation2 + $0x7]]  ;;  %v101_v23 = vmul.f32 2.0, %v934_v14  ;;  %vm105_vm6 = vweird.f32 %v934_v14 }
  0x15   : > { %v152_v15 = vmul.f32 %v923_v6, %v151_v12  ;;  %v938_v17 = vadd.f32 %v58_v8, %v932_v13  ;;  %vm71_vm0 = vcmp.gt.f32.partialorder %v932_v13, 1e-24  ;;  %s941_s5 = sld [smem:[#allocation4 + $0x1]]  ;;  %v179_v19 = vstv %s913_s26 }
  0x16   : > { %v149_v16 = vadd.f32 %v148_v10, %v147_v11  ;;  %v177_v18 = vstv %s740_s27  ;;  %v947_v20 = vsel %vm71_vm0, %v932_v13, 1.0  ;;  %s750_s6 = sld [smem:[#allocation2 + $0x2]]  ;;  %v102_v35 = vsub.f32 1.0, %v101_v23 }
  0x17   : > { %828 = vrsqrt.f32 %v938_v17  ;;  %v178_v22 = vmul.f32 %v177_v18, %v915_v2  ;;  %s751_s7 = sld [smem:[#allocation2 + $0x3]]  ;;  %v182_v24 = vstv %s741_s28  ;;  %vm66_vm1 = vweird.f32 %v938_v17 }
  0x18   : > { %v153_v21 = vadd.f32 %v152_v15, %v149_v16  ;;  %830 = vrsqrt.f32 %v947_v20  ;;  %v211_v25 = vstv %s929_s29  ;;  %v183_v28 = vmul.f32 %v923_v6, %v182_v24  ;;  %s965_s8 = sld [smem:[#allocation2 + $0xc]] }
  0x19   : > { %v180_v27 = vadd.f32 %v179_v19, %v178_v22  ;;  %v209_v29 = vstv %s745_s30  ;;  %vm79_vm2 = vweird.f32 %v947_v20  ;;  %v103_v55 = vmul.f32 %v934_v14, %v102_v35  ;;  %s977_s9 = sld [smem:[#allocation4 + $0x6]] }
  0x1a   : > { %v154_v26 = vmul.f32 0.15915494, %v153_v21  ;;  %v210_v30 = vmul.f32 %v209_v29, %v915_v2  ;;  %v214_v31 = vstv %s746_s4  ;;  %s990_s10 = sld [smem:[#allocation2 + $0xd]] }
  0x1b   : > { %v184_v33 = vadd.f32 %v183_v28, %v180_v27  ;;  %v215_v34 = vmul.f32 %v923_v6, %v214_v31  ;;  %v242_v38 = vstv %s941_s5  ;;  %v104_v24 = vadd.f32 %v934_v14, %v103_v55  ;;  %s1030_s11 = sld [smem:[#allocation2 + $0xe]] }
  0x1c   : > { %v155_v32 = vadd.f32 0.5, %v154_v26  ;;  %v212_v36 = vadd.f32 %v211_v25, %v210_v30  ;;  %v240_v37 = vstv %s750_s6  ;;  %s1037_s12 = sld [smem:[#allocation4 + $0x7]] }
  0x1d   : > { %v829_v39 = vpop.eup %828  ;;  %v185_v41 = vmul.f32 0.15915494, %v184_v33  ;;  %v241_v42 = vmul.f32 %v240_v37, %v915_v2  ;;  %v245_v43 = vstv %s751_s7  ;;  %s1046_s13 = sld [smem:[#allocation2 + $0xf]] }
  0x1e   : > { %v156_v40 = vfloor.f32 %v155_v32  ;;  %v831_v44 = vpop.eup %830  ;;  %v61_v45 = vmul.f32 %v829_v39, %v938_v17  ;;  %v216_v46 = vadd.f32 %v215_v34, %v212_v36  ;;  %v246_v47 = vmul.f32 %v923_v6, %v245_v43  ;;  %s1051_s14 = sld [smem:[#allocation2 + $0xa]] }
  0x1f   : > { %v186_v50 = vadd.f32 0.5, %v185_v41  ;;  %v74_v51 = vmul.f32 %v831_v44, %v947_v20  ;;  %v243_v54 = vadd.f32 %v242_v38, %v241_v42  ;;  %vm67_vm3 = vweird.f32 %v829_v39  ;;  %s1063_s15 = sld [smem:[#allocation4 + $0x5]] }
  0x20   : > { %v157_v48 = vmul.f32 6.28125, %v156_v40  ;;  %v159_v49 = vmul.f32 0.0019353072, %v156_v40  ;;  %v62_v52 = vmul.f32 %v829_v39, %v61_v45  ;;  %v217_v53 = vmul.f32 0.15915494, %v216_v46  ;;  %vm68_vm5 = vmor %vm66_vm1, %vm67_vm3  ;;  %s1068_s16 = sld [smem:[#allocation2 + $0xb]] }
  0x21   : > { %v187_v57 = vfloor.f32 %v186_v50  ;;  %v75_v58 = vmul.f32 %v831_v44, %v74_v51  ;;  %vm80_vm4 = vweird.f32 %v831_v44  ;;  %v247_v61 = vadd.f32 %v246_v47, %v243_v54  ;;  %s1083_s1 = sld [smem:[#allocation2 + $0x10]] }
  0x22   : > { %v158_v56 = vsub.f32 %v153_v21, %v157_v48  ;;  %v63_v59 = vmul.f32 0.5, %v62_v52  ;;  %v218_v60 = vadd.f32 0.5, %v217_v53  ;;  %vm982_vm7 = vmor %vm79_vm2, %vm80_vm4  ;;  %v271_v20 = vstv %s965_s8  ;;  %s1090_s2 = sld [smem:[#allocation4 + $0x8]] }
  0x23   : > { %v188_v63 = vmul.f32 6.28125, %v187_v57  ;;  %v190_v0 = vmul.f32 0.0019353072, %v187_v57  ;;  %v76_v5 = vmul.f32 0.5, %v75_v58  ;;  %v248_v9 = vmul.f32 0.15915494, %v247_v61 }
  0x24   : > { %v967_v62 = vsub.f32 %v158_v56, %v159_v49  ;;  %v64_v7 = vsub.f32 1.5, %v63_v59  ;;  %v219_v8 = vfloor.f32 %v218_v60  ;;  %v272_v38 = vmul.f32 %v271_v20, %v915_v2  ;;  %s1093_s21 = sld [smem:[#allocation2 + $0x11]] }
  0x25   : > { %v189_v11 = vsub.f32 %v184_v33, %v188_v63  ;;  %v77_v12 = vsub.f32 1.5, %v76_v5  ;;  %v249_v21 = vadd.f32 0.5, %v248_v9  ;;  %v1027_v51 = vsel %vm105_vm6, %v934_v14, %v104_v24  ;;  %s1104_s22 = sld [smem:[#allocation2 + $0x8]] }
  0x26   : > { %v971_v10 = vmul.f32 %v967_v62, %v967_v62  ;;  %v65_v15 = vmul.f32 %v829_v39, %v64_v7  ;;  %v220_v18 = vmul.f32 6.28125, %v219_v8  ;;  %v222_v19 = vmul.f32 0.0019353072, %v219_v8  ;;  %s1112_s23 = sld [smem:[#allocation4 + $0x4]] }
  0x27   : > { %v987_v22 = vsub.f32 %v189_v11, %v190_v0  ;;  %v78_v23 = vmul.f32 %v831_v44, %v77_v12  ;;  %v250_v27 = vfloor.f32 %v249_v21  ;;  %v276_v52 = vstv %s990_s10  ;;  %s1120_s24 = sld [smem:[#allocation2 + $0x9]] }
  0x28   : > { %v162_v17 = vmul.f32 2.1470546e-06, %v971_v10  ;;  %v69_v25 = vsel %vm68_vm5, %v829_v39, %v65_v15  ;;  %v221_v26 = vsub.f32 %v216_v46, %v220_v18  ;;  %v273_v46 = vstv %s977_s9  ;;  %s1130_s25 = sld [smem:[#allocation4 + $0xc]] }
  0x29   : > { %v994_v29 = vmul.f32 %v919_v4, %v69_v25  ;;  %v192_v30 = vmul.f32 %v987_v22, %v987_v22  ;;  %v82_v31 = vsel %vm982_vm7, %v831_v44, %v78_v23  ;;  %v251_v34 = vmul.f32 6.28125, %v250_v27  ;;  %s1133_s26 = sld [smem:[#allocation2 + $0x18]] }
  0x2a   : > { %v163_v28 = vadd.f32 -0.0001926318, %v162_v17  ;;  %v83_v32 = vsel %vm71_vm0, %v82_v31, 0.0  ;;  %v1002_v33 = vsub.f32 %v221_v26, %v222_v19  ;;  %v253_v35 = vmul.f32 0.0019353072, %v250_v27  ;;  %s1150_s27 = sld [smem:[#allocation2 + $0x19]] }
  0x2b   : > { %v193_v37 = vmul.f32 2.1470546e-06, %v192_v30  ;;  %v84_v4 = vmul.f32 %v83_v32, %v932_v13  ;;  %v86_v39 = vmul.f32 %v911_v1, %v83_v32  ;;  %v1009_v40 = vmul.f32 %v917_v3, %v83_v32  ;;  %s1167_s28 = sld [smem:[#allocation2 + $0x1a]] }
  0x2c   : > { %v164_v36 = vmul.f32 %v163_v28, %v971_v10  ;;  %v224_v41 = vmul.f32 %v1002_v33, %v1002_v33  ;;  %v252_v42 = vsub.f32 %v247_v61, %v251_v34  ;;  %v94_v1 = vmul.f32 3.0, %v994_v29  ;;  %s1188_s29 = sld [smem:[#allocation4 + $0xd]] }
  0x2d   : > { %v194_v44 = vadd.f32 -0.0001926318, %v193_v37  ;;  %v1013_v45 = vmul.f32 %v84_v4, %v69_v25  ;;  %v1018_v47 = vsel %vm71_vm0, %v86_v39, 1.0  ;;  %v123_v13 = vmul.f32 0.0, %v1009_v40  ;;  %s1204_s30 = sld [smem:[#allocation2 + $0x1b]] }
  0x2e   : > { %v165_v43 = vadd.f32 0.00830885, %v164_v36  ;;  %v225_v48 = vmul.f32 2.1470546e-06, %v224_v41  ;;  %v1020_v49 = vsub.f32 %v252_v42, %v253_v35  ;;  %v274_v55 = vadd.f32 %v273_v46, %v272_v38  ;;  %s1207_s4 = sld [smem:[#allocation2 + $0x16]] }
  0x2f   : > { %v195_v50 = vmul.f32 %v194_v44, %v192_v30  ;;  %v1040_v58 = vmul.f32 -1.0, %v1013_v45  ;;  %v125_v14 = vmul.f32 0.0, %v1018_v47  ;;  %v98_v61 = vmul.f32 %v94_v1, %v994_v29  ;;  %s1214_s5 = sld [smem:[#allocation4 + $0xb]] }
  0x30   : > { %v166_v3 = vmul.f32 %v165_v43, %v971_v10  ;;  %v226_v53 = vadd.f32 -0.0001926318, %v225_v48  ;;  %v1035_v54 = vmul.f32 %v1020_v49, %v1020_v49  ;;  %v277_v63 = vmul.f32 %v923_v6, %v276_v52  ;;  %s1218_s6 = sld [smem:[#allocation2 + $0x17]] }
  0x31   : > { %v196_v57 = vadd.f32 0.00830885, %v195_v50  ;;  %v174_v5 = vmul.f32 0.48860252, %v994_v29  ;;  %v205_v8 = vmul.f32 0.48860252, %v1040_v58  ;;  %v1054_v9 = vsub.f32 %v1018_v47, %v123_v13 }
  0x32   : > { %v167_v56 = vadd.f32 -0.16662401, %v166_v3  ;;  %v227_v59 = vmul.f32 %v226_v53, %v224_v41  ;;  %v256_v60 = vmul.f32 2.1470546e-06, %v1035_v54  ;;  %v278_v15 = vadd.f32 %v277_v63, %v274_v55  ;;  %s1228_s7 = sld [smem:[#allocation4 + $0xe]] }
  0x33   : > { %v197_v7 = vmul.f32 %v196_v57, %v192_v30  ;;  %v1057_v19 = vmul.f32 5.0, %v994_v29  ;;  %v1060_v17 = vadd.f32 %v125_v14, %v1009_v40  ;;  %v206_v27 = vmul.f32 %v205_v8, %v1054_v9  ;;  %s1236_s8 = sld [smem:[#allocation2 + $0x1c]] }
  0x34   : > { %v168_v0 = vmul.f32 %v167_v56, %v971_v10  ;;  %v228_v11 = vadd.f32 0.00830885, %v227_v59  ;;  %v257_v12 = vadd.f32 -0.0001926318, %v256_v60  ;;  %v735_v10 = vadd.f32 -1.0, %v98_v61  ;;  %s1244_s9 = sld [smem:[#allocation2 + $0x1d]] }
  0x35   : > { %v198_v18 = vadd.f32 -0.16662401, %v197_v7  ;;  %v279_v24 = vmul.f32 0.15915494, %v278_v15  ;;  %v304_v20 = vstv %s1030_s11  ;;  %v237_v31 = vmul.f32 %v205_v8, %v1060_v17  ;;  %s1259_s10 = sld [smem:[#allocation4 + $0xa]] }
  0x36   : > { %v169_v16 = vadd.f32 0.99997914, %v168_v0  ;;  %v229_v21 = vmul.f32 %v228_v11, %v224_v41  ;;  %v258_v23 = vmul.f32 %v257_v12, %v1035_v54  ;;  %v107_v35 = vmul.f32 %v735_v10, %v1027_v51  ;;  %s1263_s11 = sld [smem:[#allocation2 + $0x14]] }
  0x37   : > { %v199_v26 = vmul.f32 %v198_v18, %v192_v30  ;;  %v95_v30 = vmul.f32 %v94_v1, %v1040_v58  ;;  %v280_v36 = vadd.f32 0.5, %v279_v24  ;;  %v305_v38 = vmul.f32 %v304_v20, %v915_v2  ;;  %s1310_s17 = sld [smem:[#allocation4 + $0x9]] }
  0x38   : > { %v170_v25 = vmul.f32 %v169_v16, %v967_v62  ;;  %v230_v28 = vadd.f32 -0.16662401, %v229_v21  ;;  %v259_v62 = vadd.f32 0.00830885, %v258_v23  ;;  %v306_v39 = vstv %s1037_s12  ;;  %s1272_s12 = sld [smem:[#allocation2 + $0x15]] }
  0x39   : > { %v200_v34 = vadd.f32 0.99997914, %v199_v26  ;;  %v281_v43 = vfloor.f32 %v280_v36  ;;  %v309_v44 = vstv %s1046_s13  ;;  %v336_v46 = vstv %s1051_s14  ;;  %s1288_s13 = sld [smem:[#allocation4 + $0xf]] }
  0x3a   : > { %v171_v32 = vmul.f32 0.2820948, %v170_v25  ;;  %v231_v37 = vmul.f32 %v230_v28, %v224_v41  ;;  %v260_v4 = vmul.f32 %v259_v62, %v1035_v54  ;;  %v307_v3 = vadd.f32 %v306_v39, %v305_v38  ;;  %s1293_s14 = sld [smem:[#allocation2 + $0x1e]] }
  0x3b   : > { %v201_v42 = vmul.f32 %v200_v34, %v987_v22  ;;  %v310_v41 = vmul.f32 %v923_v6, %v309_v44  ;;  %v282_v52 = vmul.f32 6.28125, %v281_v43  ;;  %v284_v13 = vmul.f32 0.0019353072, %v281_v43  ;;  %s1316_s18 = sld [smem:[#allocation2 + $0x13]] }
  0x3c   : > { %173 = vst [vmem:[%s1075_s19] sm:$0xff] %v171_v32  ;;  %v232_v48 = vadd.f32 0.99997914, %v231_v37  ;;  %v261_v1 = vadd.f32 -0.16662401, %v260_v4  ;;  %v337_v53 = vmul.f32 %v336_v46, %v915_v2  ;;  %v1098_v56 = vmul.f32 %v1057_v19, %v95_v30 }
  0x3d   : > { %v202_v50 = vmul.f32 %v201_v42, %v174_v5  ;;  %v311_v57 = vadd.f32 %v310_v41, %v307_v3  ;;  %v283_v14 = vsub.f32 %v278_v15, %v282_v52  ;;  %v338_v59 = vstv %s1063_s15  ;;  %s1298_s15 = sld [smem:[#allocation2 + $0x1f]] }
  0x3e   : > { %v233_v22 = vmul.f32 %v232_v48, %v1002_v33  ;;  %v262_v55 = vmul.f32 %v261_v1, %v1035_v54  ;;  %v341_v60 = vstv %s1068_s16  ;;  %v90_v61 = vmul.f32 -3.0, %v1013_v45  ;;  %s1306_s16 = sld [smem:[#allocation2 + $0x12]] }
  0x3f   : > { %743 = vst [vmem:[%s1075_s19 + $0x40] sm:$0xff] %v202_v50  ;;  %v312_v5 = vmul.f32 0.15915494, %v311_v57  ;;  %v339_v7 = vadd.f32 %v338_v59, %v337_v53  ;;  %v1107_v33 = vmul.f32 %v107_v35, %v1057_v19  ;;  %v1109_v54 = vsub.f32 %v283_v14, %v284_v13 }
  0x40   : > { %v234_v63 = vmul.f32 %v233_v22, %v206_v27  ;;  %v263_v0 = vadd.f32 0.99997914, %v262_v55  ;;  %v300_v8 = vmul.f32 0.3641828, %v95_v30  ;;  %v342_v11 = vmul.f32 %v923_v6, %v341_v60 }
  0x41   : > { %v313_v15 = vadd.f32 0.5, %v312_v5  ;;  %v1117_v16 = vmul.f32 %v90_v61, %v1040_v58  ;;  %v369_v18 = vstv %s1083_s1  ;;  %v286_v10 = vmul.f32 %v1109_v54, %v1109_v54 }
  0x42   : > { %748 = vst [vmem:[%s1075_s19 + $0x60] sm:$0xff] %v234_v63  ;;  %v264_v12 = vmul.f32 %v263_v0, %v1020_v49  ;;  %v343_v21 = vadd.f32 %v342_v11, %v339_v7  ;;  %v127_v23 = vmul.f32 %v1054_v9, %v1018_v47  ;;  %v370_v24 = vmul.f32 %v369_v18, %v915_v2 }
  0x43   : > { %v314_v49 = vfloor.f32 %v313_v15  ;;  %v128_v26 = vmul.f32 %v1060_v17, %v1009_v40  ;;  %v371_v27 = vstv %s1090_s2  ;;  %v287_v20 = vmul.f32 2.1470546e-06, %v286_v10 }
  0x44   : > { %v265_v25 = vmul.f32 %v264_v12, %v237_v31  ;;  %v344_v28 = vmul.f32 0.15915494, %v343_v21  ;;  %v372_v62 = vadd.f32 %v371_v27, %v370_v24  ;;  %v374_v30 = vstv %s1093_s21 }
  0x45   : > { %v1136_v32 = vmul.f32 0.63078314, %v107_v35  ;;  %v315_v34 = vmul.f32 6.28125, %v314_v49  ;;  %v317_v31 = vmul.f32 0.0019353072, %v314_v49  ;;  %v375_v36 = vmul.f32 %v923_v6, %v374_v30 }
  0x46   : > { %753 = vst [vmem:[%s1075_s19 + $0x20] sm:$0xff] %v265_v25  ;;  %v288_v37 = vadd.f32 -0.0001926318, %v287_v20  ;;  %v1140_v4 = vmul.f32 %v300_v8, %v1054_v9  ;;  %v345_v38 = vadd.f32 0.5, %v344_v28  ;;  %v1143_v39 = vmul.f32 0.1820914, %v1117_v16 }
  0x47   : > { %v316_v42 = vsub.f32 %v311_v57, %v315_v34  ;;  %v1145_v43 = vsub.f32 %v127_v23, %v128_v26  ;;  %v376_v44 = vadd.f32 %v375_v36, %v372_v62  ;;  %v401_v46 = vstv %s1104_s22 }
  0x48   : > { %v289_v35 = vmul.f32 %v288_v37, %v286_v10  ;;  %v346_v48 = vfloor.f32 %v345_v38  ;;  %v402_v1 = vmul.f32 %v401_v46, %v915_v2  ;;  %v403_v3 = vstv %s1112_s23 }
  0x49   : > { %v1152_v41 = vsub.f32 %v316_v42, %v317_v31  ;;  %v1155_v50 = vmul.f32 %v300_v8, %v1060_v17  ;;  %v377_v52 = vmul.f32 0.15915494, %v376_v44  ;;  %v406_v13 = vstv %s1120_s24 }
  0x4a   : > { %v290_v53 = vadd.f32 0.00830885, %v289_v35  ;;  %v347_v22 = vmul.f32 6.28125, %v346_v48  ;;  %v349_v55 = vmul.f32 0.0019353072, %v346_v48  ;;  %v1160_v57 = vmul.f32 %v1143_v39, %v1145_v43 }
  0x4b   : > { %v319_v14 = vmul.f32 %v1152_v41, %v1152_v41  ;;  %v378_v59 = vadd.f32 0.5, %v377_v52  ;;  %v404_v60 = vadd.f32 %v403_v3, %v402_v1  ;;  %v407_v61 = vmul.f32 %v923_v6, %v406_v13 }
  0x4c   : > { %v291_v63 = vmul.f32 %v290_v53, %v286_v10  ;;  %v348_v0 = vsub.f32 %v343_v21, %v347_v22  ;;  %v130_v5 = vmul.f32 %v1060_v17, %v1018_v47  ;;  %v873_v12 = vmov 3.0  }
  0x4d   : > { %v320_v7 = vmul.f32 2.1470546e-06, %v319_v14  ;;  %v379_v8 = vfloor.f32 %v378_v59  ;;  %v408_v11 = vadd.f32 %v407_v61, %v404_v60  ;;  %832 = vrcp.f32 %v873_v12 }
  0x4e   : > { %v292_v15 = vadd.f32 -0.16662401, %v291_v63  ;;  %v1169_v18 = vsub.f32 %v348_v0, %v349_v55  ;;  %v432_v23 = vstv %s1133_s26  ;;  %v434_v24 = vstv %s1130_s25 }
  0x4f   : > { %v321_v25 = vadd.f32 -0.0001926318, %v320_v7  ;;  %v380_v49 = vmul.f32 6.28125, %v379_v8  ;;  %v382_v26 = vmul.f32 0.0019353072, %v379_v8  ;;  %v433_v21 = vmul.f32 %v432_v23, %v915_v2 }
  0x50   : > { %v293_v27 = vmul.f32 %v292_v15, %v286_v10  ;;  %v1176_v20 = vmul.f32 %v1169_v18, %v1169_v18  ;;  %v409_v28 = vmul.f32 0.15915494, %v408_v11  ;;  %v437_v62 = vstv %s1150_s27 }
  0x51   : > { %v322_v30 = vmul.f32 %v321_v25, %v319_v14  ;;  %v381_v34 = vsub.f32 %v376_v44, %v380_v49  ;;  %v435_v31 = vadd.f32 %v434_v24, %v433_v21  ;;  %v438_v36 = vmul.f32 %v923_v6, %v437_v62 }
  0x52   : > { %v294_v37 = vadd.f32 0.99997914, %v293_v27  ;;  %v352_v38 = vmul.f32 2.1470546e-06, %v1176_v20  ;;  %v131_v42 = vmul.f32 %v1054_v9, %v1009_v40  ;;  %v410_v46 = vadd.f32 0.5, %v409_v28 }
  0x53   : > { %v1183_v10 = vpop.eup %832  ;;  %v323_v35 = vadd.f32 0.00830885, %v322_v30  ;;  %v1185_v48 = vsub.f32 %v381_v34, %v382_v26  ;;  %v439_v1 = vadd.f32 %v438_v36, %v435_v31  ;;  %v120_v3 = vmul.f32 3.0, %v1040_v58 }
  0x54   : > { %v295_v44 = vmul.f32 %v294_v37, %v1109_v54  ;;  %v353_v52 = vadd.f32 -0.0001926318, %v352_v38  ;;  %v411_v13 = vfloor.f32 %v410_v46  ;;  %v112_v53 = vmul.f32 3.0, %v1183_v10 }
  0x55   : > { %v324_v22 = vmul.f32 %v323_v35, %v319_v14  ;;  %v1194_v55 = vmul.f32 %v1185_v48, %v1185_v48  ;;  %v440_v59 = vmul.f32 0.15915494, %v439_v1  ;;  %v465_v60 = vstv %s1167_s28 }
  0x56   : > { %v296_v61 = vmul.f32 %v295_v44, %v1136_v32  ;;  %v354_v58 = vmul.f32 %v353_v52, %v1176_v20  ;;  %v412_v63 = vmul.f32 6.28125, %v411_v13  ;;  %v414_v0 = vmul.f32 0.0019353072, %v411_v13 }
  0x57   : > { %v325_v7 = vadd.f32 -0.16662401, %v324_v22  ;;  %v385_v54 = vmul.f32 2.1470546e-06, %v1194_v55  ;;  %v113_v8 = vsub.f32 1.0, %v112_v53  ;;  %v441_v12 = vadd.f32 0.5, %v440_v59 }
  0x58   : > { %758 = vst [vmem:[%s1075_s19 + $0xc0] sm:$0xff] %v296_v61  ;;  %v355_v15 = vadd.f32 0.00830885, %v354_v58  ;;  %v1201_v23 = vadd.f32 %v131_v42, %v130_v5  ;;  %v413_v24 = vsub.f32 %v408_v11, %v412_v63  ;;  %v121_v25 = vsub.f32 %v1098_v56, %v120_v3 }
  0x59   : > { %v326_v32 = vmul.f32 %v325_v7, %v319_v14  ;;  %v386_v49 = vadd.f32 -0.0001926318, %v385_v54  ;;  %v442_v26 = vfloor.f32 %v441_v12  ;;  %v466_v21 = vmul.f32 %v465_v60, %v915_v2 }
  0x5a   : > { %v356_v27 = vmul.f32 %v355_v15, %v1176_v20  ;;  %v1210_v28 = vsub.f32 %v413_v24, %v414_v0  ;;  %v114_v5 = vmul.f32 %v1183_v10, %v113_v8  ;;  %v122_v11 = vmul.f32 %v121_v25, %v1027_v51 }
  0x5b   : > { %v327_v56 = vadd.f32 0.99997914, %v326_v32  ;;  %v387_v62 = vmul.f32 %v386_v49, %v1194_v55  ;;  %v443_v14 = vmul.f32 6.28125, %v442_v26  ;;  %v467_v30 = vstv %s1188_s29 }
  0x5c   : > { %v357_v34 = vadd.f32 -0.16662401, %v356_v27  ;;  %v1222_v31 = vmul.f32 %v1210_v28, %v1210_v28  ;;  %v445_v36 = vmul.f32 0.0019353072, %v442_v26  ;;  %v461_v37 = vmul.f32 0.3046972, %v122_v11 }
  0x5d   : > { %v328_v38 = vmul.f32 %v327_v56, %v1152_v41  ;;  %v388_v42 = vadd.f32 0.00830885, %v387_v62  ;;  %v1226_v51 = vmul.f32 2.0, %v994_v29  ;;  %v444_v46 = vsub.f32 %v439_v1, %v443_v14 }
  0x5e   : > { %v358_v35 = vmul.f32 %v357_v34, %v1176_v20  ;;  %v417_v3 = vmul.f32 2.1470546e-06, %v1222_v31  ;;  %vm116_vm8 = vweird.f32 %v1183_v10  ;;  %v1234_v44 = vmul.f32 %v461_v37, %v1054_v9 }
  0x5f   : > { %v329_v41 = vmul.f32 %v328_v38, %v1140_v4  ;;  %v389_v29 = vmul.f32 %v388_v42, %v1194_v55  ;;  %v1240_v1 = vsub.f32 %v444_v46, %v445_v36  ;;  %v468_v52 = vadd.f32 %v467_v30, %v466_v21 }
  0x60   : > { %v359_v13 = vadd.f32 0.99997914, %v358_v35  ;;  %v418_v20 = vadd.f32 -0.0001926318, %v417_v3  ;;  %v115_v53 = vadd.f32 %v1183_v10, %v114_v5  ;;  %v470_v22 = vstv %s1204_s30 }
  0x61   : > { %763 = vst [vmem:[%s1075_s19 + $0xe0] sm:$0xff] %v329_v41  ;;  %v390_v9 = vadd.f32 -0.16662401, %v389_v29  ;;  %v447_v59 = vmul.f32 %v1240_v1, %v1240_v1  ;;  %v471_v4 = vmul.f32 %v923_v6, %v470_v22  ;;  %v497_v60 = vstv %s1207_s4 }
  0x62   : > { %v360_v61 = vmul.f32 %v359_v13, %v1169_v18  ;;  %v419_v58 = vmul.f32 %v418_v20, %v1222_v31  ;;  %v498_v63 = vmul.f32 %v497_v60, %v915_v2  ;;  %v499_v0 = vstv %s1214_s5 }
  0x63   : > { %v391_v7 = vmul.f32 %v390_v9, %v1194_v55  ;;  %v448_v54 = vmul.f32 2.1470546e-06, %v447_v59  ;;  %v472_v8 = vadd.f32 %v471_v4, %v468_v52  ;;  %v1257_v12 = vmul.f32 %v461_v37, %v1060_v17 }
  0x64   : > { %v361_v15 = vmul.f32 %v360_v61, %v1155_v50  ;;  %v420_v18 = vadd.f32 0.00830885, %v419_v58  ;;  %v500_v24 = vadd.f32 %v499_v0, %v498_v63  ;;  %v502_v25 = vstv %s1218_s6 }
  0x65   : > { %v392_v32 = vadd.f32 0.99997914, %v391_v7  ;;  %v449_v49 = vadd.f32 -0.0001926318, %v448_v54  ;;  %v473_v55 = vmul.f32 0.15915494, %v472_v8  ;;  %v503_v26 = vmul.f32 %v923_v6, %v502_v25 }
  0x66   : > { %768 = vst [vmem:[%s1075_s19 + $0xa0] sm:$0xff] %v361_v15  ;;  %v421_v21 = vmul.f32 %v420_v18, %v1222_v31  ;;  %v110_v17 = vsub.f32 %v1107_v33, %v1226_v51  ;;  %v530_v27 = vstv %s1236_s8  ;;  %v532_v5 = vstv %s1228_s7 }
  0x67   : > { %v393_v50 = vmul.f32 %v392_v32, %v1185_v48  ;;  %v450_v11 = vmul.f32 %v449_v49, %v447_v59  ;;  %v474_v56 = vadd.f32 0.5, %v473_v55  ;;  %v504_v62 = vadd.f32 %v503_v26, %v500_v24 }
  0x68   : > { %v422_v14 = vadd.f32 -0.16662401, %v421_v21  ;;  %v117_v30 = vsel %vm116_vm8, %v1183_v10, %v115_v53  ;;  %v531_v34 = vmul.f32 %v530_v27, %v915_v2  ;;  %v535_v36 = vstv %s1244_s9 }
  0x69   : > { %v394_v33 = vmul.f32 %v393_v50, %v1160_v57  ;;  %v451_v37 = vadd.f32 0.00830885, %v450_v11  ;;  %v475_v38 = vfloor.f32 %v474_v56  ;;  %v505_v42 = vmul.f32 0.15915494, %v504_v62 }
  0x6a   : > { %v398_v48 = vmul.f32 %v1143_v39, %v1201_v23  ;;  %v423_v51 = vmul.f32 %v422_v14, %v1222_v31  ;;  %v533_v46 = vadd.f32 %v532_v5, %v531_v34  ;;  %v536_v35 = vmul.f32 %v923_v6, %v535_v36 }
  0x6b   : > { %773 = vst [vmem:[%s1075_s19 + $0x100] sm:$0xff] %v394_v33  ;;  %v452_v10 = vmul.f32 %v451_v37, %v447_v59  ;;  %v476_v3 = vmul.f32 6.28125, %v475_v38  ;;  %v478_v41 = vmul.f32 0.0019353072, %v475_v38  ;;  %v506_v29 = vadd.f32 0.5, %v505_v42 }
  0x6c   : > { %v424_v57 = vadd.f32 0.99997914, %v423_v51  ;;  %v118_v52 = vmul.f32 %v117_v30, %v110_v17  ;;  %v537_v13 = vadd.f32 %v536_v35, %v533_v46  ;;  %v562_v20 = vstv %s1263_s11 }
  0x6d   : > { %v453_v53 = vadd.f32 -0.16662401, %v452_v10  ;;  %v477_v22 = vsub.f32 %v472_v8, %v476_v3  ;;  %v507_v9 = vfloor.f32 %v506_v29  ;;  %v563_v39 = vmul.f32 %v562_v20, %v915_v2 }
  0x6e   : > { %v425_v31 = vmul.f32 %v424_v57, %v1210_v28  ;;  %v538_v4 = vmul.f32 0.15915494, %v537_v13  ;;  %v564_v60 = vstv %s1259_s10  ;;  %v567_v61 = vstv %s1272_s12 }
  0x6f   : > { %v454_v58 = vmul.f32 %v453_v53, %v447_v59  ;;  %v1295_v63 = vsub.f32 %v477_v22, %v478_v41  ;;  %v508_v0 = vmul.f32 6.28125, %v507_v9  ;;  %v510_v7 = vmul.f32 0.0019353072, %v507_v9 }
  0x70   : > { %v426_v54 = vmul.f32 %v425_v31, %v398_v48  ;;  %v539_v8 = vadd.f32 0.5, %v538_v4  ;;  %v565_v15 = vadd.f32 %v564_v60, %v563_v39  ;;  %v568_v18 = vmul.f32 %v923_v6, %v567_v61 }
  0x71   : > { %v429_v24 = vmul.f32 0.7463527, %v118_v52  ;;  %v455_v28 = vadd.f32 0.99997914, %v454_v58  ;;  %v480_v25 = vmul.f32 %v1295_v63, %v1295_v63  ;;  %v509_v32 = vsub.f32 %v504_v62, %v508_v0 }
  0x72   : > { %778 = vst [vmem:[%s1075_s19 + $0x80] sm:$0xff] %v426_v54  ;;  %v540_v59 = vfloor.f32 %v539_v8  ;;  %v569_v49 = vadd.f32 %v568_v18, %v565_v15  ;;  %v595_v30 = vstv %s1293_s14  ;;  %v600_v42 = vstv %s1298_s15 }
  0x73   : > { %v456_v55 = vmul.f32 %v455_v28, %v1240_v1  ;;  %v481_v26 = vmul.f32 2.1470546e-06, %v480_v25  ;;  %v1304_v21 = vsub.f32 %v509_v32, %v510_v7  ;;  %v597_v1 = vstv %s1288_s13 }
  0x74   : > { %v541_v17 = vmul.f32 6.28125, %v540_v59  ;;  %v543_v27 = vmul.f32 0.0019353072, %v540_v59  ;;  %v570_v5 = vmul.f32 0.15915494, %v569_v49  ;;  %v596_v33 = vmul.f32 %v595_v30, %v915_v2 }
  0x75   : > { %v457_v50 = vmul.f32 %v456_v55, %v429_v24  ;;  %v482_v11 = vadd.f32 -0.0001926318, %v481_v26  ;;  %v512_v56 = vmul.f32 %v1304_v21, %v1304_v21  ;;  %v601_v35 = vmul.f32 %v923_v6, %v600_v42 }
  0x76   : > { %v542_v62 = vsub.f32 %v537_v13, %v541_v17  ;;  %v571_v14 = vadd.f32 0.5, %v570_v5  ;;  %v598_v46 = vadd.f32 %v597_v1, %v596_v33  ;;  %v627_v13 = vstv %s1306_s16 }
  0x77   : > { %783 = vst [vmem:[%s1075_s19 + $0x180] sm:$0xff] %v457_v50  ;;  %v483_v34 = vmul.f32 %v482_v11, %v480_v25  ;;  %v513_v36 = vmul.f32 2.1470546e-06, %v512_v56  ;;  %v628_v22 = vmul.f32 %v627_v13, %v915_v2  ;;  %v629_v4 = vstv %s1310_s17 }
  0x78   : > { %v1318_v37 = vsub.f32 %v542_v62, %v543_v27  ;;  %v572_v38 = vfloor.f32 %v571_v14  ;;  %v602_v52 = vadd.f32 %v601_v35, %v598_v46  ;;  %v632_v8 = vstv %s1316_s18 }
  0x79   : > { %v484_v48 = vadd.f32 0.00830885, %v483_v34  ;;  %v514_v51 = vadd.f32 -0.0001926318, %v513_v36  ;;  %v630_v58 = vadd.f32 %v629_v4, %v628_v22  ;;  %v633_v24 = vmul.f32 %v923_v6, %v632_v8 }
  0x7a   : > { %v545_v10 = vmul.f32 %v1318_v37, %v1318_v37  ;;  %v573_v3 = vmul.f32 6.28125, %v572_v38  ;;  %v575_v41 = vmul.f32 0.0019353072, %v572_v38  ;;  %v603_v31 = vmul.f32 0.15915494, %v602_v52 }
  0x7b   : > { %v485_v29 = vmul.f32 %v484_v48, %v480_v25  ;;  %v515_v57 = vmul.f32 %v514_v51, %v512_v56  ;;  %v97_v2 = vmul.f32 %v1057_v19, %v1117_v16  ;;  %v634_v26 = vadd.f32 %v633_v24, %v630_v58 }
  0x7c   : > { %v546_v20 = vmul.f32 2.1470546e-06, %v545_v10  ;;  %v574_v53 = vsub.f32 %v569_v49, %v573_v3  ;;  %v604_v54 = vadd.f32 0.5, %v603_v31 }
  0x7d   : > { %v486_v9 = vadd.f32 -0.16662401, %v485_v29  ;;  %v516_v39 = vadd.f32 0.00830885, %v515_v57  ;;  %v635_v62 = vmul.f32 0.15915494, %v634_v26 }
  0x7e   : > { %v547_v60 = vadd.f32 -0.0001926318, %v546_v20  ;;  %v576_v61 = vsub.f32 %v574_v53, %v575_v41  ;;  %v605_v59 = vfloor.f32 %v604_v54  ;;  %v526_v30 = vmul.f32 0.09635372, %v97_v2 }
  0x7f   : > { %v487_v0 = vmul.f32 %v486_v9, %v480_v25  ;;  %v517_v7 = vmul.f32 %v516_v39, %v512_v56  ;;  %v636_v36 = vadd.f32 0.5, %v635_v62  ;;  %v137_v2 = vmul.f32 %v1145_v43, %v1009_v40 }
  0x80   : > { %v548_v15 = vmul.f32 %v547_v60, %v545_v10  ;;  %v577_v18 = vmul.f32 %v576_v61, %v576_v61  ;;  %v606_v27 = vmul.f32 6.28125, %v605_v59  ;;  %v608_v5 = vmul.f32 0.0019353072, %v605_v59 }
  0x81   : > { %v488_v28 = vadd.f32 0.99997914, %v487_v0  ;;  %v518_v32 = vadd.f32 -0.16662401, %v517_v7  ;;  %v637_v42 = vfloor.f32 %v636_v36  ;;  %v527_v51 = vmul.f32 %v526_v30, %v1145_v43 }
  0x82   : > { %v549_v49 = vadd.f32 0.00830885, %v548_v15  ;;  %v578_v55 = vmul.f32 2.1470546e-06, %v577_v18  ;;  %v607_v1 = vsub.f32 %v602_v52, %v606_v27  ;;  %v559_v9 = vmul.f32 %v526_v30, %v1201_v23 }
  0x83   : > { %v489_v17 = vmul.f32 %v488_v28, %v1295_v63  ;;  %v519_v25 = vmul.f32 %v518_v32, %v512_v56  ;;  %v638_v3 = vmul.f32 6.28125, %v637_v42  ;;  %v640_v41 = vmul.f32 0.0019353072, %v637_v42 }
  0x84   : > { %v550_v50 = vmul.f32 %v549_v49, %v545_v10  ;;  %v579_v11 = vadd.f32 -0.0001926318, %v578_v55  ;;  %v609_v38 = vsub.f32 %v607_v1, %v608_v5  ;;  %v134_v60 = vmul.f32 %v1201_v23, %v1009_v40 }
  0x85   : > { %v490_v6 = vmul.f32 %v489_v17, %v1234_v44  ;;  %v520_v14 = vadd.f32 0.99997914, %v519_v25 }
  0x86   : > { %v551_v34 = vadd.f32 -0.16662401, %v550_v50  ;;  %v580_v19 = vmul.f32 %v579_v11, %v577_v18  ;;  %v610_v46 = vmul.f32 %v609_v38, %v609_v38 }
  0x87   : > { %788 = vst [vmem:[%s1075_s19 + $0x1a0] sm:$0xff] %v490_v6  ;;  %v521_v33 = vmul.f32 %v520_v14, %v1304_v21  ;;  %v639_v21 = vsub.f32 %v634_v26, %v638_v3 }
  0x88   : > { %v552_v63 = vmul.f32 %v551_v34, %v545_v10  ;;  %v581_v56 = vadd.f32 0.00830885, %v580_v19  ;;  %v611_v29 = vmul.f32 2.1470546e-06, %v610_v46  ;;  %v92_v10 = vmul.f32 -5.0, %v1013_v45 }
  0x89   : > { %v522_v48 = vmul.f32 %v521_v33, %v1257_v12  ;;  %v641_v12 = vsub.f32 %v639_v21, %v640_v41 }
  0x8a   : > { %v553_v44 = vadd.f32 0.99997914, %v552_v63  ;;  %v582_v35 = vmul.f32 %v581_v56, %v577_v18  ;;  %v612_v13 = vadd.f32 -0.0001926318, %v611_v29  ;;  %v93_v4 = vmul.f32 %v92_v10, %v1117_v16 }
  0x8b   : > { %793 = vst [vmem:[%s1075_s19 + $0x160] sm:$0xff] %v522_v48  ;;  %v642_v31 = vmul.f32 %v641_v12, %v641_v12  ;;  %v136_v16 = vmul.f32 %v1201_v23, %v1018_v47 }
  0x8c   : > { %v554_v57 = vmul.f32 %v553_v44, %v1318_v37  ;;  %v583_v52 = vadd.f32 -0.16662401, %v582_v35  ;;  %v613_v22 = vmul.f32 %v612_v13, %v610_v46  ;;  %v133_v37 = vmul.f32 %v1145_v43, %v1018_v47 }
  0x8d   : > { %v643_v0 = vmul.f32 2.1470546e-06, %v642_v31  ;;  %v138_v17 = vadd.f32 %v137_v2, %v136_v16 }
  0x8e   : > { %v555_v20 = vmul.f32 %v554_v57, %v527_v51  ;;  %v584_v53 = vmul.f32 %v583_v52, %v577_v18  ;;  %v614_v45 = vadd.f32 0.00830885, %v613_v22  ;;  %v135_v15 = vsub.f32 %v133_v37, %v134_v60 }
  0x8f   : > { %v644_v8 = vadd.f32 -0.0001926318, %v643_v0  ;;  %v591_v18 = vmul.f32 0.039336238, %v93_v4 }
  0x90   : > { %798 = vst [vmem:[%s1075_s19 + $0x1c0] sm:$0xff] %v555_v20  ;;  %v585_v39 = vadd.f32 0.99997914, %v584_v53  ;;  %v615_v7 = vmul.f32 %v614_v45, %v610_v46 }
  0x91   : > { %v645_v28 = vmul.f32 %v644_v8, %v642_v31  ;;  %v624_v50 = vmul.f32 %v591_v18, %v138_v17 }
  0x92   : > { %v586_v58 = vmul.f32 %v585_v39, %v576_v61  ;;  %v616_v24 = vadd.f32 -0.16662401, %v615_v7  ;;  %v592_v61 = vmul.f32 %v591_v18, %v135_v15 }
  0x93   : > { %v646_v59 = vadd.f32 0.00830885, %v645_v28 }
  0x94   : > { %v587_v54 = vmul.f32 %v586_v58, %v559_v9  ;;  %v617_v32 = vmul.f32 %v616_v24, %v610_v46 }
  0x95   : > { %v647_v55 = vmul.f32 %v646_v59, %v642_v31 }
  0x96   : > { %803 = vst [vmem:[%s1075_s19 + $0x140] sm:$0xff] %v587_v54  ;;  %v618_v49 = vadd.f32 0.99997914, %v617_v32 }
  0x97   : > { %v648_v25 = vadd.f32 -0.16662401, %v647_v55 }
  0x98   : > { %v619_v26 = vmul.f32 %v618_v49, %v609_v38 }
  0x99   : > { %v649_v5 = vmul.f32 %v648_v25, %v642_v31 }
  0x9a   : > { %v620_v27 = vmul.f32 %v619_v26, %v592_v61 }
  0x9b   : > { %v650_v11 = vadd.f32 0.99997914, %v649_v5 }
  0x9c   : > { %808 = vst [vmem:[%s1075_s19 + $0x1e0] sm:$0xff] %v620_v27 }
  0x9d   : > { %v651_v62 = vmul.f32 %v650_v11, %v641_v12  ;;  %43 = sbr.rel (!%p41_p0) target bundleno = 12 (0xc), region = 68 }
  0x9f   : > { %v652_v6 = vmul.f32 %v651_v62, %v624_v50 }
  0xa1   : > { %813 = vst [vmem:[%s1075_s19 + $0x120] sm:$0xff] %v652_v6 }
  0xa2   :  { %660 = vsyncpa [#allocation3], 1 }
  0xa3   :  { %661 = vsyncpa [#allocation5], 1 }

</bundles_post_ra>
